<compile_context>
chip_gen: v7x
topology: tpu7x:2x2x1
jax: 0.10.0
libtpu: 0.0.40
codegen_flags: <defaults>
</compile_context>

<pallas_src>
import jax
import jax.numpy as jnp
from jax.experimental import pallas as pl
from jax.experimental.pallas import tpu as pltpu

H1, H2, H_OUT = 512, 256, 1


def _disc_kernel(x_ref, w1_ref, b1_ref, w2_ref, b2_ref, w3r_ref, b3_ref, o_ref):
    """Fused 3-layer MLP: 2 MXU matmuls + VPU/XLU final layer + activations."""
    x = x_ref[...]
    w1 = w1_ref[...]          # [F, 512]   (bf16 by default, f32 optional)
    w2 = w2_ref[...]          # [512, 256]

    # ---- Layer 1: [tile_b, F] @ [F, 512] on the MXU, f32 accumulation ----
    h1 = jnp.dot(x.astype(w1.dtype), w1, preferred_element_type=jnp.float32)
    h1 = h1 + b1_ref[...]
    h1 = jnp.maximum(h1, 0.2 * h1)                            # LeakyReLU(0.2)

    # ---- Layer 2: [tile_b, 512] @ [512, 256] on the MXU ----
    h2 = jnp.dot(h1.astype(w2.dtype), w2, preferred_element_type=jnp.float32)
    h2 = h2 + b2_ref[...]
    h2 = jnp.maximum(h2, 0.2 * h2)                            # LeakyReLU(0.2)

    # ---- Layer 3: out_features == 1 -> VPU multiply + XLU lane reduction ----
    w3_row = w3r_ref[...]                                     # (1, 256) f32
    h3 = jnp.sum(h2 * w3_row, axis=-1, keepdims=True) + b3_ref[...]

    o_ref[...] = jax.nn.sigmoid(h3)                           # Sigmoid (EUP)


def _round_up(x, m):
    return -(-x // m) * m


def _choose_tile_b(B):
    """Single-shot for small batches; otherwise >=2 grid steps (v7x megacore),
    tile a multiple of 8.  Batches with no clean divisor get padded."""
    if B <= 256:
        return B                          # latency-bound: grid=(1,) is fine
    cap = min(512, B // 2)                # guarantees at least 2 grid steps
    cap8 = max(8, cap - cap % 8)
    for t in range(cap8, 7, -8):          # largest multiple-of-8 divisor
        if B % t == 0:
            return t
    return min(256, cap8)                 # no divisor: pad batch to this tile


def _vmem_cap_bytes():
    """~75% of physical VMEM; conservative (v7x-sized) fallback."""
    try:
        info = pltpu.get_tpu_info()
        phys = int(getattr(info, "vmem_capacity_bytes", 64 * 2**20))
    except Exception:
        phys = 64 * 2**20
    return (phys * 3) // 4


def discriminator_forward(x, params, *, tile_b=None, use_bf16=True,
                          single_buffer_params=True, pad_features=True):
    """x: [B, F].  params: dict w1,b1,w2,b2,w3,b3 with [in, out] weight layout."""
    B, F = x.shape

    w1, b1 = params["w1"], params["b1"]
    w2, b2 = params["w2"], params["b2"]
    w3, b3 = params["w3"], params["b3"]

    # K-dim alignment: pad features to a multiple of 128 (zeros are exact).
    if pad_features and F % 128 != 0:
        Fp = _round_up(F, 128)
        x = jnp.pad(x, ((0, 0), (0, Fp - F)))
        w1 = jnp.pad(w1, ((0, Fp - F), (0, 0)))
        F = Fp

    if tile_b is None:
        tile_b = _choose_tile_b(B)
    tile_b = min(tile_b, B)

    # Batch padding if tile_b does not divide B (rows of zeros, sliced off).
    B_pad = _round_up(B, tile_b)
    if B_pad != B:
        x = jnp.pad(x, ((0, B_pad - B), (0, 0)))

    # Matmul-operand dtype for layers 1/2 (f32 accumulation either way).
    if use_bf16:
        w1 = w1.astype(jnp.bfloat16)
        w2 = w2.astype(jnp.bfloat16)
    # Layer-3 weight as a lane-dense (1, 256) f32 row; biases stay f32.
    w3_row = w3.reshape(1, H2).astype(jnp.float32)
    b1 = b1.reshape(1, H1).astype(jnp.float32)
    b2 = b2.reshape(1, H2).astype(jnp.float32)
    b3 = b3.reshape(1, H_OUT).astype(jnp.float32)

    grid = (B_pad // tile_b,)
    full = lambda i: (0, 0)               # grid-invariant blocks

    wbytes = 2 if use_bf16 else 4
    xbytes = x.dtype.itemsize
    param_bufs = 1 if single_buffer_params else 2
    est = (2 * tile_b * F * xbytes                     # x tile, double-buffered
           + param_bufs * (F * H1 + H1 * H2) * wbytes  # resident weights
           + tile_b * (H1 + H2) * 4                    # h1/h2 temporaries
           + 2 * tile_b * 4)                           # output tile
    vmem_limit = min(_vmem_cap_bytes(), 2 * est) if est > 12 * 2**20 else None

    cost = pl.CostEstimate(
        flops=2 * B_pad * (F * H1 + H1 * H2 + H2),
        transcendentals=2 * B_pad,                     # sigmoid ~ exp + recip
        bytes_accessed=(B_pad * F * xbytes + B_pad * 4
                        + (F * H1 + H1 * H2) * wbytes
                        + (H1 + H2 + H2 + 1) * 4),
    )

    def build(single_buffer):
        if single_buffer:
            pspec = lambda shape: pl.BlockSpec(shape, full,
                                               pipeline_mode=pl.Buffered(1))
        else:
            pspec = lambda shape: pl.BlockSpec(shape, full)
        return pl.pallas_call(
            _disc_kernel,
            out_shape=jax.ShapeDtypeStruct((B_pad, H_OUT), jnp.float32),
            grid_spec=pltpu.PrefetchScalarGridSpec(
                num_scalar_prefetch=0,
                grid=grid,
                in_specs=[
                    pl.BlockSpec((tile_b, F), lambda i: (i, 0)),   # x tile
                    pspec((F, H1)),                                # w1
                    pspec((1, H1)),                                # b1
                    pspec((H1, H2)),                               # w2
                    pspec((1, H2)),                                # b2
                    pspec((1, H2)),                                # w3 row
                    pspec((1, H_OUT)),                             # b3
                ],
                out_specs=pl.BlockSpec((tile_b, H_OUT), lambda i: (i, 0)),
            ),
            compiler_params=pltpu.CompilerParams(
                dimension_semantics=("parallel",),
                vmem_limit_bytes=vmem_limit,
            ),
            cost_estimate=cost,
        )

    args = (x, w1, b1, w2, b2, w3_row, b3)
    if single_buffer_params:
        try:
            out = build(True)(*args)
        except Exception:
            # Fallback if this jax build rejects Buffered(1): default
            # (double) buffering is always legal, just uses more VMEM.
            out = build(False)(*args)
    else:
        out = build(False)(*args)

    return out[:B] if B_pad != B else out


def init_params(key, in_features):
    """Deterministic synthetic init (uniform ~ PyTorch-default-ish scale)."""
    ks = jax.random.split(key, 6)

    def lin(kw, kb, fan_in, fan_out):
        bound = 1.0 / jnp.sqrt(fan_in)
        w = jax.random.uniform(kw, (fan_in, fan_out), jnp.float32, -bound, bound)
        b = jax.random.uniform(kb, (1, fan_out), jnp.float32, -bound, bound)
        return w, b

    w1, b1 = lin(ks[0], ks[1], in_features, H1)
    w2, b2 = lin(ks[2], ks[3], H1, H2)
    w3, b3 = lin(ks[4], ks[5], H2, H_OUT)
    return {"w1": w1, "b1": b1, "w2": w2, "b2": b2, "w3": w3, "b3": b3}


def reference_forward(x, p):
    h1 = x @ p["w1"] + p["b1"]
    h1 = jnp.where(h1 > 0, h1, 0.2 * h1)
    h2 = h1 @ p["w2"] + p["b2"]
    h2 = jnp.where(h2 > 0, h2, 0.2 * h2)
    h3 = h2 @ p["w3"] + p["b3"]
    return jax.nn.sigmoid(h3)


if __name__ == "__main__":
    key = jax.random.PRNGKey(0)
    k_x, k_p, k_x2, k_x3 = jax.random.split(key, 4)

    B, F = 64, 128
    x = jax.random.normal(k_x, (B, F), jnp.float32)
    params = init_params(k_p, F)
    ref = reference_forward(x, params)

    # 1) Default fast path: bf16 MXU operands, f32 accumulation.
    out = jax.block_until_ready(discriminator_forward(x, params))
    assert out.shape == (B, 1)
    assert jnp.allclose(out, ref, atol=2e-2, rtol=2e-2), "bf16 mismatch vs reference"

    # 2) f32 operand path: tight tolerance vs reference.
    out_f32 = jax.block_until_ready(discriminator_forward(x, params, use_bf16=False))
    assert jnp.allclose(out_f32, ref, atol=1e-5, rtol=1e-5), "f32 mismatch vs reference"

    # 3) Explicit batch tiling (grid > 1, 'parallel' axis -> v7x megacore).
    out_tiled = jax.block_until_ready(
        discriminator_forward(x, params, tile_b=16, use_bf16=False))
    assert jnp.allclose(out_tiled, ref, atol=1e-5, rtol=1e-5), "tiled mismatch vs reference"

    # 4) Ragged small case: odd batch + non-128-aligned features (F padding).
    B2, F2 = 37, 96
    x2 = jax.random.normal(k_x2, (B2, F2), jnp.float32)
    params2 = init_params(jax.random.PRNGKey(1), F2)
    ref2 = reference_forward(x2, params2)
    out2 = jax.block_until_ready(discriminator_forward(x2, params2, use_bf16=False))
    assert out2.shape == (B2, 1)
    assert jnp.allclose(out2, ref2, atol=1e-5, rtol=1e-5), "F-pad mismatch vs reference"

    # 5) Batch with no multiple-of-8 divisor -> batch padding + multi-step grid.
    B3 = 260
    x3 = jax.random.normal(k_x3, (B3, F), jnp.float32)
    ref3 = reference_forward(x3, params)
    out3 = jax.block_until_ready(discriminator_forward(x3, params, use_bf16=False))
    assert out3.shape == (B3, 1)
    assert jnp.allclose(out3, ref3, atol=1e-5, rtol=1e-5), "B-pad mismatch vs reference"

    print("KERNEL_OK")
</pallas_src>

<mosaic_0001>
module attributes {stable_mosaic.version = 11 : i64} {
  func.func @_disc_kernel(%arg0: i32, %arg1: memref<64x128xf32, #tpu.memory_space<vmem>>, %arg2: memref<128x512xbf16, #tpu.memory_space<vmem>>, %arg3: memref<1x512xf32, #tpu.memory_space<vmem>>, %arg4: memref<512x256xbf16, #tpu.memory_space<vmem>>, %arg5: memref<1x256xf32, #tpu.memory_space<vmem>>, %arg6: memref<1x256xf32, #tpu.memory_space<vmem>>, %arg7: memref<1x1xf32, #tpu.memory_space<vmem>>, %arg8: memref<64x1xf32, #tpu.memory_space<vmem>>) attributes {dimension_semantics = [#tpu.dimension_semantics<parallel>], iteration_bounds = array<i64: 1>, scalar_prefetch = 0 : i64, scratch_operands = 0 : i64, tpu.core_type = #tpu.core_type<tc>, window_params = [{transform_indices = @transform_0, window_bounds = array<i64: 64, 128>}, {pipeline_mode = #tpu.pipeline_mode<synchronous>, transform_indices = @transform_1, window_bounds = array<i64: 128, 512>}, {pipeline_mode = #tpu.pipeline_mode<synchronous>, transform_indices = @transform_2, window_bounds = array<i64: 1, 512>}, {pipeline_mode = #tpu.pipeline_mode<synchronous>, transform_indices = @transform_3, window_bounds = array<i64: 512, 256>}, {pipeline_mode = #tpu.pipeline_mode<synchronous>, transform_indices = @transform_4, window_bounds = array<i64: 1, 256>}, {pipeline_mode = #tpu.pipeline_mode<synchronous>, transform_indices = @transform_5, window_bounds = array<i64: 1, 256>}, {pipeline_mode = #tpu.pipeline_mode<synchronous>, transform_indices = @transform_6, window_bounds = array<i64: 1, 1>}, {transform_indices = @transform_7, window_bounds = array<i64: 64, 1>}]} {
    %c0 = arith.constant 0 : index
    %c0_0 = arith.constant 0 : index
    %0 = vector.load %arg1[%c0, %c0_0] : memref<64x128xf32, #tpu.memory_space<vmem>>, vector<64x128xf32>
    %c0_1 = arith.constant 0 : index
    %c0_2 = arith.constant 0 : index
    %1 = vector.load %arg2[%c0_1, %c0_2] : memref<128x512xbf16, #tpu.memory_space<vmem>>, vector<128x512xbf16>
    %c0_3 = arith.constant 0 : index
    %c0_4 = arith.constant 0 : index
    %2 = vector.load %arg4[%c0_3, %c0_4] : memref<512x256xbf16, #tpu.memory_space<vmem>>, vector<512x256xbf16>
    %3 = arith.truncf %0 : vector<64x128xf32> to vector<64x128xbf16>
    %cst = arith.constant dense<0.000000e+00> : vector<64x512xf32>
    %4 = tpu.matmul %3, %1, %cst {dimension_numbers = #tpu.dot_dimension_numbers<[1], [0], [0], [1], [0, 0, 1, 1], [], []>} : vector<64x128xbf16>, vector<128x512xbf16>, vector<64x512xf32> -> vector<64x512xf32>
    %c0_5 = arith.constant 0 : index
    %c0_6 = arith.constant 0 : index
    %5 = vector.load %arg3[%c0_5, %c0_6] : memref<1x512xf32, #tpu.memory_space<vmem>>, vector<1x512xf32>
    %6 = vector.broadcast %5 : vector<1x512xf32> to vector<64x512xf32>
    %7 = arith.addf %4, %6 : vector<64x512xf32>
    %cst_7 = arith.constant 2.000000e-01 : f32
    %8 = vector.broadcast %cst_7 : f32 to vector<64x512xf32>
    %9 = arith.mulf %8, %7 : vector<64x512xf32>
    %10 = arith.maximumf %7, %9 : vector<64x512xf32>
    %11 = arith.truncf %10 : vector<64x512xf32> to vector<64x512xbf16>
    %cst_8 = arith.constant dense<0.000000e+00> : vector<64x256xf32>
    %12 = tpu.matmul %11, %2, %cst_8 {dimension_numbers = #tpu.dot_dimension_numbers<[1], [0], [0], [1], [0, 0, 1, 1], [], []>} : vector<64x512xbf16>, vector<512x256xbf16>, vector<64x256xf32> -> vector<64x256xf32>
    %c0_9 = arith.constant 0 : index
    %c0_10 = arith.constant 0 : index
    %13 = vector.load %arg5[%c0_9, %c0_10] : memref<1x256xf32, #tpu.memory_space<vmem>>, vector<1x256xf32>
    %14 = vector.broadcast %13 : vector<1x256xf32> to vector<64x256xf32>
    %15 = arith.addf %12, %14 : vector<64x256xf32>
    %cst_11 = arith.constant 2.000000e-01 : f32
    %16 = vector.broadcast %cst_11 : f32 to vector<64x256xf32>
    %17 = arith.mulf %16, %15 : vector<64x256xf32>
    %18 = arith.maximumf %15, %17 : vector<64x256xf32>
    %c0_12 = arith.constant 0 : index
    %c0_13 = arith.constant 0 : index
    %19 = vector.load %arg6[%c0_12, %c0_13] : memref<1x256xf32, #tpu.memory_space<vmem>>, vector<1x256xf32>
    %20 = vector.broadcast %19 : vector<1x256xf32> to vector<64x256xf32>
    %21 = arith.mulf %18, %20 : vector<64x256xf32>
    %cst_14 = arith.constant dense<0.000000e+00> : vector<64xf32>
    %22 = vector.multi_reduction <add>, %21, %cst_14 [1] : vector<64x256xf32> to vector<64xf32>
    %23 = vector.shape_cast %22 : vector<64xf32> to vector<64x1xf32>
    %c0_15 = arith.constant 0 : index
    %c0_16 = arith.constant 0 : index
    %24 = vector.load %arg7[%c0_15, %c0_16] : memref<1x1xf32, #tpu.memory_space<vmem>>, vector<1x1xf32>
    %25 = vector.broadcast %24 : vector<1x1xf32> to vector<64x1xf32>
    %26 = arith.addf %23, %25 : vector<64x1xf32>
    %27 = arith.negf %26 : vector<64x1xf32>
    %28 = math.exp %27 : vector<64x1xf32>
    %cst_17 = arith.constant 1.000000e+00 : f32
    %29 = vector.broadcast %cst_17 : f32 to vector<64x1xf32>
    %30 = arith.addf %29, %28 : vector<64x1xf32>
    %31 = arith.divf %29, %30 : vector<64x1xf32>
    %c0_18 = arith.constant 0 : index
    %c0_19 = arith.constant 0 : index
    %32 = vector.load %arg8[%c0_18, %c0_19] : memref<64x1xf32, #tpu.memory_space<vmem>>, vector<64x1xf32>
    tpu.vector_store %arg8[%c0_18, %c0_19], %31 {strides = array<i32>} : memref<64x1xf32, #tpu.memory_space<vmem>>, vector<64x1xf32>,
    return
  }
  func.func @transform_0(%arg0: i32) -> (i32, i32) {
    %c0_i32 = arith.constant 0 : i32
    %c0_i32_0 = arith.constant 0 : i32
    return %arg0, %c0_i32 : i32, i32
  }
  func.func @transform_1(%arg0: i32) -> (i32, i32) {
    %c0_i32 = arith.constant 0 : i32
    %c0_i32_0 = arith.constant 0 : i32
    %c0_i32_1 = arith.constant 0 : i32
    return %c0_i32, %c0_i32_0 : i32, i32
  }
  func.func @transform_2(%arg0: i32) -> (i32, i32) {
    %c0_i32 = arith.constant 0 : i32
    %c0_i32_0 = arith.constant 0 : i32
    %c0_i32_1 = arith.constant 0 : i32
    return %c0_i32, %c0_i32_0 : i32, i32
  }
  func.func @transform_3(%arg0: i32) -> (i32, i32) {
    %c0_i32 = arith.constant 0 : i32
    %c0_i32_0 = arith.constant 0 : i32
    %c0_i32_1 = arith.constant 0 : i32
    return %c0_i32, %c0_i32_0 : i32, i32
  }
  func.func @transform_4(%arg0: i32) -> (i32, i32) {
    %c0_i32 = arith.constant 0 : i32
    %c0_i32_0 = arith.constant 0 : i32
    %c0_i32_1 = arith.constant 0 : i32
    return %c0_i32, %c0_i32_0 : i32, i32
  }
  func.func @transform_5(%arg0: i32) -> (i32, i32) {
    %c0_i32 = arith.constant 0 : i32
    %c0_i32_0 = arith.constant 0 : i32
    %c0_i32_1 = arith.constant 0 : i32
    return %c0_i32, %c0_i32_0 : i32, i32
  }
  func.func @transform_6(%arg0: i32) -> (i32, i32) {
    %c0_i32 = arith.constant 0 : i32
    %c0_i32_0 = arith.constant 0 : i32
    %c0_i32_1 = arith.constant 0 : i32
    return %c0_i32, %c0_i32_0 : i32, i32
  }
  func.func @transform_7(%arg0: i32) -> (i32, i32) {
    %c0_i32 = arith.constant 0 : i32
    %c0_i32_0 = arith.constant 0 : i32
    return %arg0, %c0_i32 : i32, i32
  }
}

module attributes {stable_mosaic.version = 11 : i64} {
  func.func @_disc_kernel(%arg0: i32, %arg1: memref<64x128xf32, #tpu.memory_space<vmem>>, %arg2: memref<128x512xbf16, #tpu.memory_space<vmem>>, %arg3: memref<1x512xf32, #tpu.memory_space<vmem>>, %arg4: memref<512x256xbf16, #tpu.memory_space<vmem>>, %arg5: memref<1x256xf32, #tpu.memory_space<vmem>>, %arg6: memref<1x256xf32, #tpu.memory_space<vmem>>, %arg7: memref<1x1xf32, #tpu.memory_space<vmem>>, %arg8: memref<64x1xf32, #tpu.memory_space<vmem>>) attributes {dimension_semantics = [#tpu.dimension_semantics<parallel>], iteration_bounds = array<i64: 1>, scalar_prefetch = 0 : i64, scratch_operands = 0 : i64, tpu.core_type = #tpu.core_type<tc>, window_params = [{transform_indices = @transform_0, window_bounds = array<i64: 64, 128>}, {pipeline_mode = #tpu.pipeline_mode<synchronous>, transform_indices = @transform_1, window_bounds = array<i64: 128, 512>}, {pipeline_mode = #tpu.pipeline_mode<synchronous>, transform_indices = @transform_2, window_bounds = array<i64: 1, 512>}, {pipeline_mode = #tpu.pipeline_mode<synchronous>, transform_indices = @transform_3, window_bounds = array<i64: 512, 256>}, {pipeline_mode = #tpu.pipeline_mode<synchronous>, transform_indices = @transform_4, window_bounds = array<i64: 1, 256>}, {pipeline_mode = #tpu.pipeline_mode<synchronous>, transform_indices = @transform_5, window_bounds = array<i64: 1, 256>}, {pipeline_mode = #tpu.pipeline_mode<synchronous>, transform_indices = @transform_6, window_bounds = array<i64: 1, 1>}, {transform_indices = @transform_7, window_bounds = array<i64: 64, 1>}]} {
    %c0 = arith.constant 0 : index
    %c0_0 = arith.constant 0 : index
    %0 = vector.load %arg1[%c0, %c0_0] : memref<64x128xf32, #tpu.memory_space<vmem>>, vector<64x128xf32>
    %c0_1 = arith.constant 0 : index
    %c0_2 = arith.constant 0 : index
    %1 = vector.load %arg2[%c0_1, %c0_2] : memref<128x512xbf16, #tpu.memory_space<vmem>>, vector<128x512xbf16>
    %c0_3 = arith.constant 0 : index
    %c0_4 = arith.constant 0 : index
    %2 = vector.load %arg4[%c0_3, %c0_4] : memref<512x256xbf16, #tpu.memory_space<vmem>>, vector<512x256xbf16>
    %3 = arith.truncf %0 : vector<64x128xf32> to vector<64x128xbf16>
    %cst = arith.constant dense<0.000000e+00> : vector<64x512xf32>
    %4 = tpu.matmul %3, %1, %cst {dimension_numbers = #tpu.dot_dimension_numbers<[1], [0], [0], [1], [0, 0, 1, 1], [], []>} : vector<64x128xbf16>, vector<128x512xbf16>, vector<64x512xf32> -> vector<64x512xf32>
    %c0_5 = arith.constant 0 : index
    %c0_6 = arith.constant 0 : index
    %5 = vector.load %arg3[%c0_5, %c0_6] : memref<1x512xf32, #tpu.memory_space<vmem>>, vector<1x512xf32>
    %6 = vector.broadcast %5 : vector<1x512xf32> to vector<64x512xf32>
    %7 = arith.addf %4, %6 : vector<64x512xf32>
    %cst_7 = arith.constant 2.000000e-01 : f32
    %8 = vector.broadcast %cst_7 : f32 to vector<64x512xf32>
    %9 = arith.mulf %8, %7 : vector<64x512xf32>
    %10 = arith.maximumf %7, %9 : vector<64x512xf32>
    %11 = arith.truncf %10 : vector<64x512xf32> to vector<64x512xbf16>
    %cst_8 = arith.constant dense<0.000000e+00> : vector<64x256xf32>
    %12 = tpu.matmul %11, %2, %cst_8 {dimension_numbers = #tpu.dot_dimension_numbers<[1], [0], [0], [1], [0, 0, 1, 1], [], []>} : vector<64x512xbf16>, vector<512x256xbf16>, vector<64x256xf32> -> vector<64x256xf32>
    %c0_9 = arith.constant 0 : index
    %c0_10 = arith.constant 0 : index
    %13 = vector.load %arg5[%c0_9, %c0_10] : memref<1x256xf32, #tpu.memory_space<vmem>>, vector<1x256xf32>
    %14 = vector.broadcast %13 : vector<1x256xf32> to vector<64x256xf32>
    %15 = arith.addf %12, %14 : vector<64x256xf32>
    %cst_11 = arith.constant 2.000000e-01 : f32
    %16 = vector.broadcast %cst_11 : f32 to vector<64x256xf32>
    %17 = arith.mulf %16, %15 : vector<64x256xf32>
    %18 = arith.maximumf %15, %17 : vector<64x256xf32>
    %c0_12 = arith.constant 0 : index
    %c0_13 = arith.constant 0 : index
    %19 = vector.load %arg6[%c0_12, %c0_13] : memref<1x256xf32, #tpu.memory_space<vmem>>, vector<1x256xf32>
    %20 = vector.broadcast %19 : vector<1x256xf32> to vector<64x256xf32>
    %21 = arith.mulf %18, %20 : vector<64x256xf32>
    %cst_14 = arith.constant dense<0.000000e+00> : vector<64xf32>
    %22 = vector.multi_reduction <add>, %21, %cst_14 [1] : vector<64x256xf32> to vector<64xf32>
    %23 = vector.shape_cast %22 : vector<64xf32> to vector<64x1xf32>
    %c0_15 = arith.constant 0 : index
    %c0_16 = arith.constant 0 : index
    %24 = vector.load %arg7[%c0_15, %c0_16] : memref<1x1xf32, #tpu.memory_space<vmem>>, vector<1x1xf32>
    %25 = vector.broadcast %24 : vector<1x1xf32> to vector<64x1xf32>
    %26 = arith.addf %23, %25 : vector<64x1xf32>
    %27 = arith.negf %26 : vector<64x1xf32>
    %28 = math.exp %27 : vector<64x1xf32>
    %cst_17 = arith.constant 1.000000e+00 : f32
    %29 = vector.broadcast %cst_17 : f32 to vector<64x1xf32>
    %30 = arith.addf %29, %28 : vector<64x1xf32>
    %31 = arith.divf %29, %30 : vector<64x1xf32>
    %c0_18 = arith.constant 0 : index
    %c0_19 = arith.constant 0 : index
    %32 = vector.load %arg8[%c0_18, %c0_19] : memref<64x1xf32, #tpu.memory_space<vmem>>, vector<64x1xf32>
    tpu.vector_store %arg8[%c0_18, %c0_19], %31 {strides = array<i32>} : memref<64x1xf32, #tpu.memory_space<vmem>>, vector<64x1xf32>,
    return
  }
  func.func @transform_0(%arg0: i32) -> (i32, i32) {
    %c0_i32 = arith.constant 0 : i32
    %c0_i32_0 = arith.constant 0 : i32
    return %arg0, %c0_i32 : i32, i32
  }
  func.func @transform_1(%arg0: i32) -> (i32, i32) {
    %c0_i32 = arith.constant 0 : i32
    %c0_i32_0 = arith.constant 0 : i32
    %c0_i32_1 = arith.constant 0 : i32
    return %c0_i32, %c0_i32_0 : i32, i32
  }
  func.func @transform_2(%arg0: i32) -> (i32, i32) {
    %c0_i32 = arith.constant 0 : i32
    %c0_i32_0 = arith.constant 0 : i32
    %c0_i32_1 = arith.constant 0 : i32
    return %c0_i32, %c0_i32_0 : i32, i32
  }
  func.func @transform_3(%arg0: i32) -> (i32, i32) {
    %c0_i32 = arith.constant 0 : i32
    %c0_i32_0 = arith.constant 0 : i32
    %c0_i32_1 = arith.constant 0 : i32
    return %c0_i32, %c0_i32_0 : i32, i32
  }
  func.func @transform_4(%arg0: i32) -> (i32, i32) {
    %c0_i32 = arith.constant 0 : i32
    %c0_i32_0 = arith.constant 0 : i32
    %c0_i32_1 = arith.constant 0 : i32
    return %c0_i32, %c0_i32_0 : i32, i32
  }
  func.func @transform_5(%arg0: i32) -> (i32, i32) {
    %c0_i32 = arith.constant 0 : i32
    %c0_i32_0 = arith.constant 0 : i32
    %c0_i32_1 = arith.constant 0 : i32
    return %c0_i32, %c0_i32_0 : i32, i32
  }
  func.func @transform_6(%arg0: i32) -> (i32, i32) {
    %c0_i32 = arith.constant 0 : i32
    %c0_i32_0 = arith.constant 0 : i32
    %c0_i32_1 = arith.constant 0 : i32
    return %c0_i32, %c0_i32_0 : i32, i32
  }
  func.func @transform_7(%arg0: i32) -> (i32, i32) {
    %c0_i32 = arith.constant 0 : i32
    %c0_i32_0 = arith.constant 0 : i32
    return %arg0, %c0_i32 : i32, i32
  }
}

</mosaic_0001>

<bundles_post_ra>
// kernel: tpu_custom_call.1
= control target key start
LH: loop header
LB: loop body
LE: loop exit
PB: predicated region body
PF: predicated region fallthrough
CT: control target
= control target key end

     0   :  { %s1843_s0 = inlined_call_operand.hbm [shape: f32[64,128], index: 0, kind: input, shape index: {}]   ;;  %s1844_s1 = inlined_call_operand.hbm [shape: bf16[128,512], index: 1, kind: input, shape index: {}]   ;;  %s1845_s2 = inlined_call_operand.vmem [shape: f32[1,512], index: 2, kind: input, shape index: {}]   ;;  %s1846_s3 = inlined_call_operand.hbm [shape: bf16[512,256], index: 3, kind: input, shape index: {}]   ;;  %s1847_s4 = inlined_call_operand.vmem [shape: f32[1,256], index: 4, kind: input, shape index: {}]   ;;  %s1848_s5 = inlined_call_operand.vmem [shape: f32[1,256], index: 5, kind: input, shape index: {}]   ;;  %s1849_s6 = inlined_call_operand.<no memory space> [shape: f32[1,1], index: 6, kind: input, shape index: {}]   ;;  %s1850_s7 = inlined_call_operand.vmem [shape: f32[64,1], index: 7, kind: output, shape index: {}]  }
   0x1   :  { %v12_v0 = vstv %s1849_s6 }
   0x2   :  { %13 = vst [vmem:[#allocation2] sm:$0x1] %v12_v0 }
   0x3   :  { %14 = vsyncpa [#allocation4], 0 }
   0x4   :  { %15 = vsyncpa [#allocation6], 0  ;;  %s1617_s26 = smov [#allocation5]   ;;  %s1547_s30 = scalar_lea.hbm %s1844_s1, 4096 }
   0x5   :  { %s33_s27 = sshll.u32 %s1617_s26, 4  ;;  %p1548_p0 = scmp.ne.s32.totalorder %s1844_s1, %s1547_s30  ;;  %s34_s27 = int_to_ptr.vmem [resolvable:$true] %s33_s27 }
   0x6   :  { %p1551_p1 = scmp.lt.u32.totalorder %s1547_s30, %s1844_s1 }
   0x8   :  { %p1553_p2 = pnand %p1551_p1, %p1548_p0 }
   0xa   :  { %1556 = shalt.err (!%p1553_p2)
}
   0xb   :  { %s1557_s6 = scalar_lea.vmem %s34_s27, 4096  ;;  %p1562_p4 = scmp.lt.s32.totalorder %s34_s27, %s34_s27 }
   0xc   :  { %p1558_p3 = scmp.ne.s32.totalorder %s34_s27, %s1557_s6  ;;  %p1563_p5 = scmp.lt.s32.totalorder %s1557_s6, %s1557_s6 }
   0xe   :  { %p1564_p6 = por %p1563_p5, %p1562_p4 }
  0x10   :  { %p1565_p7 = pnand %p1564_p6, %p1558_p3 }
  0x12   :  { %1568 = shalt.err (!%p1565_p7)
}
  0x13   :  { %s1618_s12 = smov 256   ;;  %s1619_s13 = smov 16  }
  0x14   :  { %39 = dma.hbm_to_vmem [thread:$0]  %s1844_s1, 4096, %s34_s27, [#allocation6], %s1618_s12, %s1618_s12, %s1619_s13  }
  0x15   :  { %s1620_s16 = smov [#allocation3]   ;;  %s1569_s20 = scalar_lea.hbm %s1843_s0, 1024 }
  0x16   :  { %s21_s17 = sshll.u32 %s1620_s16, 4  ;;  %p1570_p8 = scmp.ne.s32.totalorder %s1843_s0, %s1569_s20  ;;  %s22_s17 = int_to_ptr.vmem [resolvable:$true] %s21_s17 }
  0x17   :  { %p1573_p9 = scmp.lt.u32.totalorder %s1569_s20, %s1843_s0 }
  0x19   :  { %p1575_p10 = pnand %p1573_p9, %p1570_p8 }
  0x1b   :  { %1578 = shalt.err (!%p1575_p10)
}
  0x1c   :  { %s1579_s25 = scalar_lea.vmem %s22_s17, 1024  ;;  %p1584_p12 = scmp.lt.s32.totalorder %s22_s17, %s22_s17 }
  0x1d   :  { %p1580_p11 = scmp.ne.s32.totalorder %s22_s17, %s1579_s25  ;;  %p1585_p13 = scmp.lt.s32.totalorder %s1579_s25, %s1579_s25 }
  0x1f   :  { %p1586_p0 = por %p1585_p13, %p1584_p12 }
  0x21   :  { %p1587_p1 = pnand %p1586_p0, %p1580_p11 }
  0x23   :  { %1590 = shalt.err (!%p1587_p1)
}
  0x24   :  { %s1621_s1 = smov 128   ;;  %s1622_s26 = smov 8  }
  0x25   :  { %27 = dma.hbm_to_vmem [thread:$0]  %s1843_s0, 1024, %s22_s17, [#allocation4], %s1621_s1, %s1621_s1, %s1622_s26  }
  0x26   :  { %s1623_s29 = smov [#allocation7]   ;;  %s1591_s10 = scalar_lea.hbm %s1846_s3, 8192 }
  0x27   :  { %s47_s30 = sshll.u32 %s1623_s29, 4  ;;  %p1592_p2 = scmp.ne.s32.totalorder %s1846_s3, %s1591_s10  ;;  %s48_s30 = int_to_ptr.vmem [resolvable:$true] %s47_s30 }
  0x28   :  { %p1595_p3 = scmp.lt.u32.totalorder %s1591_s10, %s1846_s3 }
  0x2a   :  { %p1597_p4 = pnand %p1595_p3, %p1592_p2 }
  0x2c   :  { %1600 = shalt.err (!%p1597_p4)
}
  0x2d   :  { %s1601_s14 = scalar_lea.vmem %s48_s30, 8192  ;;  %p1606_p6 = scmp.lt.s32.totalorder %s48_s30, %s48_s30 }
  0x2e   :  { %p1602_p5 = scmp.ne.s32.totalorder %s48_s30, %s1601_s14  ;;  %p1607_p7 = scmp.lt.s32.totalorder %s1601_s14, %s1601_s14 }
  0x30   :  { %p1608_p8 = por %p1607_p7, %p1606_p6 }
  0x32   :  { %p1609_p9 = pnand %p1608_p8, %p1602_p5 }
  0x34   :  { %1612 = shalt.err (!%p1609_p9)
}
  0x35   :  { %53 = dma.hbm_to_vmem [thread:$0]  %s1846_s3, 8192, %s48_s30, [#allocation6], %s1621_s1, %s1621_s1, %s1622_s26  }
  0x36   :  { %1613 = dma.done.wait [#allocation4], 1024  }
  0x37   :  { %1614 = vsyncadd [#allocation4], 4294966272 }
  0x38   :  { %1615 = dma.done.wait [#allocation6], 12288  }
  0x39   :  { %1616 = vsyncadd [#allocation6], 4294955008  ;;  %v1624_v1 = vmov 0   ;;  %v1371_v2 = vld [vmem:[#allocation5 + $0x4] ss:$16 sps:$4 sm:$0xff]   ;;  %v71_v35 = vld [vmem:[#allocation3 + $0x8] sm:$0xff] }
  0x3a   :  { %392 = vmatprep.mubr.bf16.mxu0 %v1624_v1  ;;  %465 = vmatprep.mubr.bf16.mxu1 %v1624_v1  ;;  %v1373_v3 = vld [vmem:[#allocation5 + $0xc] ss:$16 sps:$4 sm:$0xff]   ;;  %v1375_v4 = vld [vmem:[#allocation5] ss:$16 sps:$4 sm:$0xff]   ;;  %v1376_v5 = vld [vmem:[#allocation5 + $0x8] ss:$16 sps:$4 sm:$0xff]  }
  0x3b   :  { %360 = vmatprep.subr.bf16.mxu0 %v1371_v2  ;;  %433 = vmatprep.subr.bf16.mxu1 %v1373_v3  ;;  %v1377_v6 = vld [vmem:[#allocation5 + $0x24] ss:$16 sps:$4 sm:$0xff]   ;;  %v1379_v7 = vld [vmem:[#allocation5 + $0x2c] ss:$16 sps:$4 sm:$0xff]   ;;  %v1381_v8 = vld [vmem:[#allocation5 + $0x20] ss:$16 sps:$4 sm:$0xff]  }
  0x3c   :  { %361 = vmatpush1.bf16.msra.mxu0 %v1375_v4  ;;  %434 = vmatpush1.bf16.msra.mxu1 %v1376_v5  ;;  %v1382_v9 = vld [vmem:[#allocation5 + $0x28] ss:$16 sps:$4 sm:$0xff]   ;;  %v1383_v10 = vld [vmem:[#allocation5 + $0x44] ss:$16 sps:$4 sm:$0xff]   ;;  %v1385_v11 = vld [vmem:[#allocation5 + $0x4c] ss:$16 sps:$4 sm:$0xff]  }
  0x3d   :  { %362 = vmatprep.subr.bf16.mxu0 %v1377_v6  ;;  %435 = vmatprep.subr.bf16.mxu1 %v1379_v7  ;;  %v1387_v12 = vld [vmem:[#allocation5 + $0x40] ss:$16 sps:$4 sm:$0xff]   ;;  %v1388_v13 = vld [vmem:[#allocation5 + $0x48] ss:$16 sps:$4 sm:$0xff]   ;;  %v1389_v14 = vld [vmem:[#allocation5 + $0x64] ss:$16 sps:$4 sm:$0xff]  }
  0x3e   :  { %v1391_v15 = vld [vmem:[#allocation5 + $0x6c] ss:$16 sps:$4 sm:$0xff]   ;;  %v1393_v16 = vld [vmem:[#allocation5 + $0x60] ss:$16 sps:$4 sm:$0xff]   ;;  %v1394_v17 = vld [vmem:[#allocation5 + $0x68] ss:$16 sps:$4 sm:$0xff]  }
  0x3f   :  { %v1395_v18 = vld [vmem:[#allocation5 + $0x84] ss:$16 sps:$4 sm:$0xff]   ;;  %v1397_v19 = vld [vmem:[#allocation5 + $0x8c] ss:$16 sps:$4 sm:$0xff]   ;;  %v1399_v20 = vld [vmem:[#allocation5 + $0x80] ss:$16 sps:$4 sm:$0xff]  }
  0x40   :  { %363 = vmatpush1.bf16.msra.mxu0 %v1381_v8  ;;  %436 = vmatpush1.bf16.msra.mxu1 %v1382_v9  ;;  %v1400_v21 = vld [vmem:[#allocation5 + $0x88] ss:$16 sps:$4 sm:$0xff]   ;;  %v1401_v22 = vld [vmem:[#allocation5 + $0xa4] ss:$16 sps:$4 sm:$0xff]   ;;  %v1403_v23 = vld [vmem:[#allocation5 + $0xac] ss:$16 sps:$4 sm:$0xff]  }
  0x41   :  { %364 = vmatprep.subr.bf16.mxu0 %v1383_v10  ;;  %437 = vmatprep.subr.bf16.mxu1 %v1385_v11  ;;  %v1405_v24 = vld [vmem:[#allocation5 + $0xa0] ss:$16 sps:$4 sm:$0xff]   ;;  %v1406_v25 = vld [vmem:[#allocation5 + $0xa8] ss:$16 sps:$4 sm:$0xff]   ;;  %v1407_v26 = vld [vmem:[#allocation5 + $0xc4] ss:$16 sps:$4 sm:$0xff]  }
  0x42   :  { %v1409_v27 = vld [vmem:[#allocation5 + $0xcc] ss:$16 sps:$4 sm:$0xff]   ;;  %v1411_v28 = vld [vmem:[#allocation5 + $0xc0] ss:$16 sps:$4 sm:$0xff]   ;;  %v1412_v29 = vld [vmem:[#allocation5 + $0xc8] ss:$16 sps:$4 sm:$0xff]  }
  0x43   :  { %v1413_v30 = vld [vmem:[#allocation5 + $0xe4] ss:$16 sps:$4 sm:$0xff]   ;;  %v1415_v31 = vld [vmem:[#allocation5 + $0xec] ss:$16 sps:$4 sm:$0xff]   ;;  %v1417_v32 = vld [vmem:[#allocation5 + $0xe0] ss:$16 sps:$4 sm:$0xff]  }
  0x44   :  { %365 = vmatpush1.bf16.msra.mxu0 %v1387_v12  ;;  %438 = vmatpush1.bf16.msra.mxu1 %v1388_v13  ;;  %v1418_v33 = vld [vmem:[#allocation5 + $0xe8] ss:$16 sps:$4 sm:$0xff]   ;;  %v70_v34 = vld [vmem:[#allocation3] sm:$0xff]  ;;  %v1427_v41 = vld [vmem:[#allocation7 + $0x14] ss:$8 sps:$4 sm:$0xff]   ;;  %vm1211_vm0 = vcmask 7168  }
  0x45   :  { %366 = vmatprep.subr.bf16.mxu0 %v1389_v14  ;;  %439 = vmatprep.subr.bf16.mxu1 %v1391_v15  ;;  %v1421_v36 = vld [vmem:[#allocation7 + $0x4] ss:$8 sps:$4 sm:$0xff]   ;;  %v174_v38 = vpack.c.bf16 %v71_v35, %v70_v34  ;;  %v1419_v39 = vld [vmem:[#allocation7] ss:$8 sps:$4 sm:$0xff]   ;;  %v1430_v42 = vld [vmem:[#allocation7 + $0x114] ss:$8 sps:$4 sm:$0xff]  }
  0x46   :  { %v1424_v37 = vld [vmem:[#allocation7 + $0x104] ss:$8 sps:$4 sm:$0xff]   ;;  %v1422_v40 = vld [vmem:[#allocation7 + $0x100] ss:$8 sps:$4 sm:$0xff]   ;;  %v72_v43 = vld [vmem:[#allocation3 + $0x10] sm:$0xff] }
  0x47   :  { %v73_v44 = vld [vmem:[#allocation3 + $0x18] sm:$0xff]  ;;  %v1433_v47 = vld [vmem:[#allocation7 + $0x24] ss:$8 sps:$4 sm:$0xff]   ;;  %v1431_v50 = vld [vmem:[#allocation7 + $0x20] ss:$8 sps:$4 sm:$0xff]  }
  0x48   :  { %367 = vmatpush1.bf16.msra.mxu0 %v1393_v16  ;;  %440 = vmatpush1.bf16.msra.mxu1 %v1394_v17  ;;  %v1425_v45 = vld [vmem:[#allocation7 + $0x10] ss:$8 sps:$4 sm:$0xff]   ;;  %v1436_v48 = vld [vmem:[#allocation7 + $0x124] ss:$8 sps:$4 sm:$0xff]   ;;  %v175_v49 = vpack.c.bf16 %v73_v44, %v72_v43  ;;  %v1434_v51 = vld [vmem:[#allocation7 + $0x120] ss:$8 sps:$4 sm:$0xff]  }
  0x49   :  { %368 = vmatprep.subr.bf16.mxu0 %v1395_v18  ;;  %441 = vmatprep.subr.bf16.mxu1 %v1397_v19  ;;  %v1428_v46 = vld [vmem:[#allocation7 + $0x110] ss:$8 sps:$4 sm:$0xff]   ;;  %v1439_v52 = vld [vmem:[#allocation7 + $0x34] ss:$8 sps:$4 sm:$0xff]   ;;  %v74_v54 = vld [vmem:[#allocation3 + $0x20] sm:$0xff] }
  0x4a   :  { %v1442_v53 = vld [vmem:[#allocation7 + $0x134] ss:$8 sps:$4 sm:$0xff]   ;;  %v75_v55 = vld [vmem:[#allocation3 + $0x28] sm:$0xff]  ;;  %v1437_v56 = vld [vmem:[#allocation7 + $0x30] ss:$8 sps:$4 sm:$0xff]  }
  0x4b   :  { %v1440_v57 = vld [vmem:[#allocation7 + $0x130] ss:$8 sps:$4 sm:$0xff]   ;;  %v1445_v58 = vld [vmem:[#allocation7 + $0x44] ss:$8 sps:$4 sm:$0xff]   ;;  %v176_v60 = vpack.c.bf16 %v75_v55, %v74_v54  ;;  %v1443_v61 = vld [vmem:[#allocation7 + $0x40] ss:$8 sps:$4 sm:$0xff]  }
  0x4c   :  { %369 = vmatpush1.bf16.msra.mxu0 %v1399_v20  ;;  %442 = vmatpush1.bf16.msra.mxu1 %v1400_v21  ;;  %v1448_v59 = vld [vmem:[#allocation7 + $0x144] ss:$8 sps:$4 sm:$0xff]   ;;  %v1446_v62 = vld [vmem:[#allocation7 + $0x140] ss:$8 sps:$4 sm:$0xff]   ;;  %v1451_v63 = vld [vmem:[#allocation7 + $0x54] ss:$8 sps:$4 sm:$0xff]  }
  0x4d   :  { %370 = vmatprep.subr.bf16.mxu0 %v1401_v22  ;;  %443 = vmatprep.subr.bf16.mxu1 %v1403_v23  ;;  %v1454_v0 = vld [vmem:[#allocation7 + $0x154] ss:$8 sps:$4 sm:$0xff]   ;;  %v1449_v4 = vld [vmem:[#allocation7 + $0x50] ss:$8 sps:$4 sm:$0xff]   ;;  %v1457_v6 = vld [vmem:[#allocation7 + $0x64] ss:$8 sps:$4 sm:$0xff]  }
  0x4e   :  { %v76_v2 = vld [vmem:[#allocation3 + $0x30] sm:$0xff]  ;;  %v77_v3 = vld [vmem:[#allocation3 + $0x38] sm:$0xff]  ;;  %v1460_v7 = vld [vmem:[#allocation7 + $0x164] ss:$8 sps:$4 sm:$0xff]  }
  0x4f   :  { %v1452_v5 = vld [vmem:[#allocation7 + $0x150] ss:$8 sps:$4 sm:$0xff]   ;;  %v177_v8 = vpack.c.bf16 %v77_v3, %v76_v2  ;;  %v1455_v9 = vld [vmem:[#allocation7 + $0x60] ss:$8 sps:$4 sm:$0xff]   ;;  %v1463_v11 = vld [vmem:[#allocation7 + $0x74] ss:$8 sps:$4 sm:$0xff]  }
  0x50   :  { %371 = vmatpush1.bf16.msra.mxu0 %v1405_v24  ;;  %444 = vmatpush1.bf16.msra.mxu1 %v1406_v25  ;;  %v1458_v10 = vld [vmem:[#allocation7 + $0x160] ss:$8 sps:$4 sm:$0xff]   ;;  %v1466_v12 = vld [vmem:[#allocation7 + $0x174] ss:$8 sps:$4 sm:$0xff]   ;;  %v1464_v13 = vld [vmem:[#allocation7 + $0x170] ss:$8 sps:$4 sm:$0xff]  }
  0x51   :  { %372 = vmatprep.subr.bf16.mxu0 %v1407_v26  ;;  %445 = vmatprep.subr.bf16.mxu1 %v1409_v27  ;;  %v1469_v14 = vld [vmem:[#allocation7 + $0x84] ss:$8 sps:$4 sm:$0xff]   ;;  %v1467_v16 = vld [vmem:[#allocation7 + $0x80] ss:$8 sps:$4 sm:$0xff]   ;;  %v1475_v18 = vld [vmem:[#allocation7 + $0x94] ss:$8 sps:$4 sm:$0xff]  }
  0x52   :  { %v1472_v15 = vld [vmem:[#allocation7 + $0x184] ss:$8 sps:$4 sm:$0xff]   ;;  %v1470_v17 = vld [vmem:[#allocation7 + $0x180] ss:$8 sps:$4 sm:$0xff]   ;;  %v1478_v19 = vld [vmem:[#allocation7 + $0x194] ss:$8 sps:$4 sm:$0xff]  }
  0x53   :  { %v1473_v20 = vld [vmem:[#allocation7 + $0x90] ss:$8 sps:$4 sm:$0xff]   ;;  %v1481_v22 = vld [vmem:[#allocation7 + $0xa4] ss:$8 sps:$4 sm:$0xff]   ;;  %v1479_v24 = vld [vmem:[#allocation7 + $0xa0] ss:$8 sps:$4 sm:$0xff]  }
  0x54   :  { %373 = vmatpush1.bf16.msra.mxu0 %v1411_v28  ;;  %446 = vmatpush1.bf16.msra.mxu1 %v1412_v29  ;;  %v1476_v21 = vld [vmem:[#allocation7 + $0x190] ss:$8 sps:$4 sm:$0xff]   ;;  %v1484_v23 = vld [vmem:[#allocation7 + $0x1a4] ss:$8 sps:$4 sm:$0xff]   ;;  %v1482_v25 = vld [vmem:[#allocation7 + $0x1a0] ss:$8 sps:$4 sm:$0xff]  }
  0x55   :  { %374 = vmatprep.subr.bf16.mxu0 %v1413_v30  ;;  %447 = vmatprep.subr.bf16.mxu1 %v1415_v31  ;;  %v1487_v26 = vld [vmem:[#allocation7 + $0xb4] ss:$8 sps:$4 sm:$0xff]   ;;  %v1485_v28 = vld [vmem:[#allocation7 + $0xb0] ss:$8 sps:$4 sm:$0xff]   ;;  %v1493_v30 = vld [vmem:[#allocation7 + $0xc4] ss:$8 sps:$4 sm:$0xff]  }
  0x56   :  { %v1490_v27 = vld [vmem:[#allocation7 + $0x1b4] ss:$8 sps:$4 sm:$0xff]   ;;  %v1488_v29 = vld [vmem:[#allocation7 + $0x1b0] ss:$8 sps:$4 sm:$0xff]   ;;  %v1496_v31 = vld [vmem:[#allocation7 + $0x1c4] ss:$8 sps:$4 sm:$0xff]  }
  0x57   :  { %v1499_v34 = vld [vmem:[#allocation7 + $0xd4] ss:$8 sps:$4 sm:$0xff]   ;;  %v1509_v44 = vld [vmem:[#allocation7 + $0xf0] ss:$8 sps:$4 sm:$0xff]  }
  0x58   :  { %375 = vmatpush1.bf16.msra.mxu0 %v1417_v32  ;;  %448 = vmatpush1.bf16.msra.mxu1 %v1418_v33  ;;  %v1491_v32 = vld [vmem:[#allocation7 + $0xc0] ss:$8 sps:$4 sm:$0xff]   ;;  %v1502_v35 = vld [vmem:[#allocation7 + $0x1d4] ss:$8 sps:$4 sm:$0xff]  }
  0x59   :  { %918 = vmatprep.subr.bf16.mxu1 %v1421_v36  ;;  %991 = vmatprep.subr.bf16.mxu0 %v1424_v37  ;;  %v1494_v33 = vld [vmem:[#allocation7 + $0x1c0] ss:$8 sps:$4 sm:$0xff]   ;;  %v1497_v36 = vld [vmem:[#allocation7 + $0xd0] ss:$8 sps:$4 sm:$0xff]   ;;  %v1514_v43 = vld [vmem:[#allocation7 + $0x1f4] ss:$8 sps:$4 sm:$0xff]  }
  0x5a   :  { %v1500_v37 = vld [vmem:[#allocation7 + $0x1d0] ss:$8 sps:$4 sm:$0xff]  }
  0x5b   :  { %393 = vmatmul.mubr.bf16.vlgmr.msra.gmra.mrb[0].mxu0 %v174_v38  ;;  %466 = vmatmul.mubr.bf16.vlgmr.msra.gmra.mrb[0].mxu1 %v174_v38  ;;  %v1505_v38 = vld [vmem:[#allocation7 + $0xe4] ss:$8 sps:$4 sm:$0xff]  }
  0x5c   :  { %402 = vmatprep.mubr.bf16.mxu0 %v1624_v1  ;;  %475 = vmatprep.mubr.bf16.mxu1 %v1624_v1 }
  0x5d   :  { %919 = vmatpush1.bf16.msra.mxu1 %v1419_v39  ;;  %992 = vmatpush1.bf16.msra.mxu0 %v1422_v40  ;;  %v1508_v39 = vld [vmem:[#allocation7 + $0x1e4] ss:$8 sps:$4 sm:$0xff]   ;;  %v1503_v40 = vld [vmem:[#allocation7 + $0xe0] ss:$8 sps:$4 sm:$0xff]  }
  0x5e   :  { %920 = vmatprep.subr.bf16.mxu1 %v1427_v41  ;;  %993 = vmatprep.subr.bf16.mxu0 %v1430_v42  ;;  %v1506_v41 = vld [vmem:[#allocation7 + $0x1e0] ss:$8 sps:$4 sm:$0xff]   ;;  %v1511_v42 = vld [vmem:[#allocation7 + $0xf4] ss:$8 sps:$4 sm:$0xff]  }
  0x61   :  { %921 = vmatpush1.bf16.msra.mxu1 %v1425_v45  ;;  %994 = vmatpush1.bf16.msra.mxu0 %v1428_v46  ;;  %v1512_v45 = vld [vmem:[#allocation7 + $0x1f0] ss:$8 sps:$4 sm:$0xff]   ;;  %v180_v46 = vlaneseq }
  0x62   :  { %922 = vmatprep.subr.bf16.mxu1 %v1433_v47  ;;  %995 = vmatprep.subr.bf16.mxu0 %v1436_v48 }
  0x63   :  { %403 = vmatmul.mubr.bf16.gmra.mrb[4].mxu0 %v175_v49  ;;  %476 = vmatmul.mubr.bf16.gmra.mrb[4].mxu1 %v175_v49  ;;  %v181_v47 = vshrl.u32 %v180_v46, 7 }
  0x64   :  { %412 = vmatprep.mubr.bf16.mxu0 %v1624_v1  ;;  %485 = vmatprep.mubr.bf16.mxu1 %v1624_v1 }
  0x65   :  { %923 = vmatpush1.bf16.msra.mxu1 %v1431_v50  ;;  %996 = vmatpush1.bf16.msra.mxu0 %v1434_v51  ;;  %v1712_v48 = vsub.s32 0, %v181_v47  ;;  %v190_v49 = vsub.s32 2, %v181_v47  ;;  %v178_v50 = vld [vmem:[%s1845_s2] sm:$0xf]  ;;  %v1717_v51 = vsub.s32 1, %v181_v47 }
  0x66   :  { %924 = vmatprep.subr.bf16.mxu1 %v1439_v52  ;;  %997 = vmatprep.subr.bf16.mxu0 %v1442_v53  ;;  %v194_v52 = vsub.s32 3, %v181_v47 }
  0x67   :  { %v1720_v53 = vrot.slane %v178_v50, %v1712_v48  ;;  %v1722_v54 = vrot.slane %v178_v50, %v190_v49  ;;  %v1725_v55 = vrot.slane %v178_v50, %v1717_v51 }
  0x69   :  { %925 = vmatpush1.bf16.msra.mxu1 %v1437_v56  ;;  %998 = vmatpush1.bf16.msra.mxu0 %v1440_v57  ;;  %v1727_v56 = vrot.slane %v178_v50, %v194_v52 }
  0x6a   :  { %926 = vmatprep.subr.bf16.mxu1 %v1445_v58  ;;  %999 = vmatprep.subr.bf16.mxu0 %v1448_v59 }
  0x6b   :  { %413 = vmatmul.mubr.bf16.gmra.mrb[8].mxu0 %v176_v60  ;;  %486 = vmatmul.mubr.bf16.gmra.mrb[8].mxu1 %v176_v60 }
  0x6c   :  { %422 = vmatprep.mubr.bf16.mxu0 %v1624_v1  ;;  %495 = vmatprep.mubr.bf16.mxu1 %v1624_v1  ;;  %v1461_v1 = vld [vmem:[#allocation7 + $0x70] ss:$8 sps:$4 sm:$0xff]  }
  0x6d   :  { %927 = vmatpush1.bf16.msra.mxu1 %v1443_v61  ;;  %1000 = vmatpush1.bf16.msra.mxu0 %v1446_v62 }
  0x6e   :  { %928 = vmatprep.subr.bf16.mxu1 %v1451_v63  ;;  %1001 = vmatprep.subr.bf16.mxu0 %v1454_v0 }
  0x71   :  { %929 = vmatpush1.bf16.msra.mxu1 %v1449_v4  ;;  %1002 = vmatpush1.bf16.msra.mxu0 %v1452_v5 }
  0x72   :  { %930 = vmatprep.subr.bf16.mxu1 %v1457_v6  ;;  %1003 = vmatprep.subr.bf16.mxu0 %v1460_v7 }
  0x73   :  { %423 = vmatmul.mubr.bf16.gmra.mrb[12].mxu0 %v177_v8  ;;  %496 = vmatmul.mubr.bf16.gmra.mrb[12].mxu1 %v177_v8 }
  0x75   :  { %931 = vmatpush1.bf16.msra.mxu1 %v1455_v9  ;;  %1004 = vmatpush1.bf16.msra.mxu0 %v1458_v10 }
  0x76   :  { %932 = vmatprep.subr.bf16.mxu1 %v1463_v11  ;;  %1005 = vmatprep.subr.bf16.mxu0 %v1466_v12 }
  0x79   :  { %933 = vmatpush1.bf16.msra.mxu1 %v1461_v1  ;;  %1006 = vmatpush1.bf16.msra.mxu0 %v1464_v13 }
  0x7a   :  { %934 = vmatprep.subr.bf16.mxu1 %v1469_v14  ;;  %1007 = vmatprep.subr.bf16.mxu0 %v1472_v15 }
  0x7d   :  { %935 = vmatpush1.bf16.msra.mxu1 %v1467_v16  ;;  %1008 = vmatpush1.bf16.msra.mxu0 %v1470_v17 }
  0x7e   :  { %936 = vmatprep.subr.bf16.mxu1 %v1475_v18  ;;  %1009 = vmatprep.subr.bf16.mxu0 %v1478_v19 }
  0x81   :  { %937 = vmatpush1.bf16.msra.mxu1 %v1473_v20  ;;  %1010 = vmatpush1.bf16.msra.mxu0 %v1476_v21 }
  0x82   :  { %938 = vmatprep.subr.bf16.mxu1 %v1481_v22  ;;  %1011 = vmatprep.subr.bf16.mxu0 %v1484_v23 }
  0x85   :  { %939 = vmatpush1.bf16.msra.mxu1 %v1479_v24  ;;  %1012 = vmatpush1.bf16.msra.mxu0 %v1482_v25 }
  0x86   :  { %940 = vmatprep.subr.bf16.mxu1 %v1487_v26  ;;  %1013 = vmatprep.subr.bf16.mxu0 %v1490_v27 }
  0x89   :  { %941 = vmatpush1.bf16.msra.mxu1 %v1485_v28  ;;  %1014 = vmatpush1.bf16.msra.mxu0 %v1488_v29 }
  0x8a   :  { %942 = vmatprep.subr.bf16.mxu1 %v1493_v30  ;;  %1015 = vmatprep.subr.bf16.mxu0 %v1496_v31 }
  0x8d   :  { %943 = vmatpush1.bf16.msra.mxu1 %v1491_v32  ;;  %1016 = vmatpush1.bf16.msra.mxu0 %v1494_v33 }
  0x8e   :  { %944 = vmatprep.subr.bf16.mxu1 %v1499_v34  ;;  %1017 = vmatprep.subr.bf16.mxu0 %v1502_v35 }
  0x91   :  { %945 = vmatpush1.bf16.msra.mxu1 %v1497_v36  ;;  %1018 = vmatpush1.bf16.msra.mxu0 %v1500_v37 }
  0x92   :  { %946 = vmatprep.subr.bf16.mxu1 %v1505_v38  ;;  %1019 = vmatprep.subr.bf16.mxu0 %v1508_v39 }
  0x95   :  { %947 = vmatpush1.bf16.msra.mxu1 %v1503_v40  ;;  %1020 = vmatpush1.bf16.msra.mxu0 %v1506_v41 }
  0x96   :  { %948 = vmatprep.subr.bf16.mxu1 %v1511_v42  ;;  %1021 = vmatprep.subr.bf16.mxu0 %v1514_v43 }
  0x99   :  { %949 = vmatpush1.bf16.msra.mxu1 %v1509_v44  ;;  %1022 = vmatpush1.bf16.msra.mxu0 %v1512_v45 }
 0x12e   :  { %v394_v57 = vpop.f32.mrb[0].mxu0  ;;  %v467_v58 = vpop.f32.mrb[0].mxu1 }
 0x12f   :  { %v395_v59 = vadd.f32 %v394_v57, %v1720_v53  ;;  %v468_v60 = vadd.f32 %v467_v58, %v1722_v54  ;;  %v396_v61 = vpop.f32.mrb[1].mxu0  ;;  %v469_v62 = vpop.f32.mrb[1].mxu1 }
 0x130   :  { %v397_v63 = vadd.f32 %v396_v61, %v1725_v55  ;;  %v470_v0 = vadd.f32 %v469_v62, %v1727_v56  ;;  %v398_v2 = vpop.f32.mrb[2].mxu0  ;;  %v471_v3 = vpop.f32.mrb[2].mxu1 }
 0x131   :  { %v506_v4 = vmul.f32 0.2, %v395_v59  ;;  %v508_v5 = vmul.f32 0.2, %v468_v60  ;;  %v399_v6 = vadd.f32 %v398_v2, %v1720_v53  ;;  %v472_v7 = vadd.f32 %v471_v3, %v1722_v54  ;;  %v400_v8 = vpop.f32.mrb[3].mxu0  ;;  %v473_v9 = vpop.f32.mrb[3].mxu1 }
 0x132   :  { %v507_v10 = vmul.f32 0.2, %v397_v63  ;;  %v509_v11 = vmul.f32 0.2, %v470_v0  ;;  %v401_v12 = vadd.f32 %v400_v8, %v1725_v55  ;;  %v474_v1 = vadd.f32 %v473_v9, %v1727_v56 }
 0x133   :  { %v510_v13 = vmul.f32 0.2, %v399_v6  ;;  %v512_v14 = vmul.f32 0.2, %v472_v7  ;;  %v538_v17 = vmax.f32 %v395_v59, %v506_v4  ;;  %v540_v18 = vmax.f32 %v468_v60, %v508_v5 }
 0x134   :  { %v511_v15 = vmul.f32 0.2, %v401_v12  ;;  %v513_v16 = vmul.f32 0.2, %v474_v1  ;;  %v539_v21 = vmax.f32 %v397_v63, %v507_v10  ;;  %v541_v22 = vmax.f32 %v470_v0, %v509_v11 }
 0x135   :  { %v542_v19 = vmax.f32 %v399_v6, %v510_v13  ;;  %v544_v20 = vmax.f32 %v472_v7, %v512_v14 }
 0x136   :  { %v543_v23 = vmax.f32 %v401_v12, %v511_v15  ;;  %v545_v24 = vmax.f32 %v474_v1, %v513_v16  ;;  %v404_v25 = vpop.f32.mrb[4].mxu0  ;;  %v477_v26 = vpop.f32.mrb[4].mxu1 }
 0x137   :  { %v570_v27 = vpack.c.bf16 %v542_v19, %v538_v17  ;;  %v572_v28 = vpack.c.bf16 %v544_v20, %v540_v18  ;;  %v405_v29 = vadd.f32 %v404_v25, %v1720_v53  ;;  %v478_v30 = vadd.f32 %v477_v26, %v1722_v54  ;;  %v406_v31 = vpop.f32.mrb[5].mxu0  ;;  %v479_v32 = vpop.f32.mrb[5].mxu1 }
 0x138   :  { %v407_v33 = vadd.f32 %v406_v31, %v1725_v55  ;;  %v480_v34 = vadd.f32 %v479_v32, %v1727_v56  ;;  %v408_v35 = vpop.f32.mrb[6].mxu0  ;;  %v481_v36 = vpop.f32.mrb[6].mxu1  ;;  %v571_v37 = vpack.c.bf16 %v543_v23, %v539_v21  ;;  %v573_v38 = vpack.c.bf16 %v545_v24, %v541_v22 }
 0x139   :  { %v514_v39 = vmul.f32 0.2, %v405_v29  ;;  %v516_v40 = vmul.f32 0.2, %v478_v30  ;;  %v409_v41 = vadd.f32 %v408_v35, %v1720_v53  ;;  %v482_v42 = vadd.f32 %v481_v36, %v1722_v54  ;;  %v410_v43 = vpop.f32.mrb[7].mxu0  ;;  %v483_v44 = vpop.f32.mrb[7].mxu1 }
 0x13a   :  { %v515_v45 = vmul.f32 0.2, %v407_v33  ;;  %v517_v46 = vmul.f32 0.2, %v480_v34  ;;  %v411_v47 = vadd.f32 %v410_v43, %v1725_v55  ;;  %v484_v49 = vadd.f32 %v483_v44, %v1727_v56  ;;  %950 = vmatprep.mubr.bf16.mxu1 %v571_v37  ;;  %1023 = vmatprep.mubr.bf16.mxu0 %v573_v38 }
 0x13b   :  { %v518_v50 = vmul.f32 0.2, %v409_v41  ;;  %v520_v52 = vmul.f32 0.2, %v482_v42  ;;  %951 = vmatmul.mubr.bf16.vlgmr.msra.gmra.mrb[16].mxu1 %v570_v27  ;;  %1024 = vmatmul.mubr.bf16.vlgmr.msra.gmra.mrb[16].mxu0 %v572_v28  ;;  %v546_v59 = vmax.f32 %v405_v29, %v514_v39  ;;  %v548_v60 = vmax.f32 %v478_v30, %v516_v40 }
 0x13c   :  { %v519_v57 = vmul.f32 0.2, %v411_v47  ;;  %v521_v58 = vmul.f32 0.2, %v484_v49  ;;  %v547_v63 = vmax.f32 %v407_v33, %v515_v45  ;;  %v549_v0 = vmax.f32 %v480_v34, %v517_v46 }
 0x13d   :  { %v550_v61 = vmax.f32 %v409_v41, %v518_v50  ;;  %v552_v62 = vmax.f32 %v482_v42, %v520_v52 }
 0x13e   :  { %v551_v2 = vmax.f32 %v411_v47, %v519_v57  ;;  %v553_v3 = vmax.f32 %v484_v49, %v521_v58  ;;  %v414_v4 = vpop.f32.mrb[8].mxu0  ;;  %v487_v5 = vpop.f32.mrb[8].mxu1 }
 0x13f   :  { %v415_v6 = vadd.f32 %v414_v4, %v1720_v53  ;;  %v488_v7 = vadd.f32 %v487_v5, %v1722_v54  ;;  %v416_v8 = vpop.f32.mrb[9].mxu0  ;;  %v489_v9 = vpop.f32.mrb[9].mxu1  ;;  %v574_v10 = vpack.c.bf16 %v550_v61, %v546_v59  ;;  %v576_v11 = vpack.c.bf16 %v552_v62, %v548_v60 }
 0x140   :  { %v417_v12 = vadd.f32 %v416_v8, %v1725_v55  ;;  %v490_v1 = vadd.f32 %v489_v9, %v1727_v56  ;;  %v418_v13 = vpop.f32.mrb[10].mxu0  ;;  %v491_v14 = vpop.f32.mrb[10].mxu1  ;;  %v575_v15 = vpack.c.bf16 %v551_v2, %v547_v63  ;;  %v577_v16 = vpack.c.bf16 %v553_v3, %v549_v0 }
 0x141   :  { %v522_v17 = vmul.f32 0.2, %v415_v6  ;;  %v524_v18 = vmul.f32 0.2, %v488_v7  ;;  %v419_v19 = vadd.f32 %v418_v13, %v1720_v53  ;;  %v492_v20 = vadd.f32 %v491_v14, %v1722_v54  ;;  %v420_v21 = vpop.f32.mrb[11].mxu0  ;;  %v493_v22 = vpop.f32.mrb[11].mxu1 }
 0x142   :  { %v523_v23 = vmul.f32 0.2, %v417_v12  ;;  %v525_v24 = vmul.f32 0.2, %v490_v1  ;;  %v421_v25 = vadd.f32 %v420_v21, %v1725_v55  ;;  %v494_v26 = vadd.f32 %v493_v22, %v1727_v56  ;;  %960 = vmatprep.mubr.bf16.mxu1 %v575_v15  ;;  %1033 = vmatprep.mubr.bf16.mxu0 %v577_v16 }
 0x143   :  { %v526_v27 = vmul.f32 0.2, %v419_v19  ;;  %v528_v28 = vmul.f32 0.2, %v492_v20  ;;  %961 = vmatmul.mubr.bf16.gmra.mrb[20].mxu1 %v574_v10  ;;  %1034 = vmatmul.mubr.bf16.gmra.mrb[20].mxu0 %v576_v11  ;;  %v554_v31 = vmax.f32 %v415_v6, %v522_v17  ;;  %v556_v32 = vmax.f32 %v488_v7, %v524_v18  ;;  %v586_v17 = vld [vmem:[%s1847_s4] sm:$0x3] }
 0x144   :  { %v527_v29 = vmul.f32 0.2, %v421_v25  ;;  %v529_v30 = vmul.f32 0.2, %v494_v26  ;;  %v555_v35 = vmax.f32 %v417_v12, %v523_v23  ;;  %v557_v36 = vmax.f32 %v490_v1, %v525_v24 }
 0x145   :  { %v558_v33 = vmax.f32 %v419_v19, %v526_v27  ;;  %v560_v34 = vmax.f32 %v492_v20, %v528_v28  ;;  %v1765_v18 = vrot.slane %v586_v17, %v1712_v48  ;;  %v1768_v19 = vrot.slane %v586_v17, %v1717_v51  ;;  %v1096_v28 = vld [vmem:[%s1848_s5] sm:$0x3] }
 0x146   :  { %v559_v37 = vmax.f32 %v421_v25, %v527_v29  ;;  %v561_v38 = vmax.f32 %v494_v26, %v529_v30  ;;  %v424_v39 = vpop.f32.mrb[12].mxu0  ;;  %v497_v40 = vpop.f32.mrb[12].mxu1 }
 0x147   :  { %v425_v41 = vadd.f32 %v424_v39, %v1720_v53  ;;  %v498_v42 = vadd.f32 %v497_v40, %v1722_v54  ;;  %v426_v43 = vpop.f32.mrb[13].mxu0  ;;  %v499_v44 = vpop.f32.mrb[13].mxu1  ;;  %v578_v45 = vpack.c.bf16 %v558_v33, %v554_v31  ;;  %v580_v46 = vpack.c.bf16 %v560_v34, %v556_v32 }
 0x148   :  { %v427_v47 = vadd.f32 %v426_v43, %v1725_v55  ;;  %v500_v49 = vadd.f32 %v499_v44, %v1727_v56  ;;  %v428_v50 = vpop.f32.mrb[14].mxu0  ;;  %v501_v52 = vpop.f32.mrb[14].mxu1  ;;  %v579_v57 = vpack.c.bf16 %v559_v37, %v555_v35  ;;  %v581_v58 = vpack.c.bf16 %v561_v38, %v557_v36 }
 0x149   :  { %v530_v59 = vmul.f32 0.2, %v425_v41  ;;  %v532_v60 = vmul.f32 0.2, %v498_v42  ;;  %v429_v61 = vadd.f32 %v428_v50, %v1720_v53  ;;  %v502_v62 = vadd.f32 %v501_v52, %v1722_v54  ;;  %v430_v63 = vpop.f32.mrb[15].mxu0  ;;  %v503_v0 = vpop.f32.mrb[15].mxu1 }
 0x14a   :  { %v531_v2 = vmul.f32 0.2, %v427_v47  ;;  %v533_v3 = vmul.f32 0.2, %v500_v49  ;;  %v431_v4 = vadd.f32 %v430_v63, %v1725_v55  ;;  %v504_v5 = vadd.f32 %v503_v0, %v1727_v56  ;;  %970 = vmatprep.mubr.bf16.mxu1 %v579_v57  ;;  %1043 = vmatprep.mubr.bf16.mxu0 %v581_v58 }
 0x14b   :  { %v534_v6 = vmul.f32 0.2, %v429_v61  ;;  %v536_v7 = vmul.f32 0.2, %v502_v62  ;;  %971 = vmatmul.mubr.bf16.gmra.mrb[24].mxu1 %v578_v45  ;;  %1044 = vmatmul.mubr.bf16.gmra.mrb[24].mxu0 %v580_v46  ;;  %v562_v10 = vmax.f32 %v425_v41, %v530_v59  ;;  %v564_v53 = vmax.f32 %v498_v42, %v532_v60 }
 0x14c   :  { %v535_v8 = vmul.f32 0.2, %v431_v4  ;;  %v537_v9 = vmul.f32 0.2, %v504_v5  ;;  %v563_v12 = vmax.f32 %v427_v47, %v531_v2  ;;  %v565_v1 = vmax.f32 %v500_v49, %v533_v3 }
 0x14d   :  { %v566_v11 = vmax.f32 %v429_v61, %v534_v6  ;;  %v568_v54 = vmax.f32 %v502_v62, %v536_v7  ;;  %v1778_v37 = vrot.slane %v1096_v28, %v1712_v48  ;;  %v1781_v40 = vrot.slane %v1096_v28, %v1717_v51 }
 0x14e   :  { %v567_v13 = vmax.f32 %v431_v4, %v535_v8  ;;  %v569_v14 = vmax.f32 %v504_v5, %v537_v9 }
 0x14f   :  { %v582_v15 = vpack.c.bf16 %v566_v11, %v562_v10  ;;  %v584_v55 = vpack.c.bf16 %v568_v54, %v564_v53 }
 0x150   :  { %v583_v16 = vpack.c.bf16 %v567_v13, %v563_v12  ;;  %v585_v56 = vpack.c.bf16 %v569_v14, %v565_v1 }
 0x152   :  { %980 = vmatprep.mubr.bf16.mxu1 %v583_v16  ;;  %1053 = vmatprep.mubr.bf16.mxu0 %v585_v56 }
 0x153   :  { %981 = vmatmul.mubr.bf16.gmra.mrb[28].mxu1 %v582_v15  ;;  %1054 = vmatmul.mubr.bf16.gmra.mrb[28].mxu0 %v584_v55 }
 0x20e   :  { %v952_v20 = vpop.f32.mrb[16].mxu1  ;;  %v1025_v21 = vpop.f32.mrb[16].mxu0 }
 0x20f   :  { %v953_v22 = vadd.f32 %v952_v20, %v1765_v18  ;;  %v954_v23 = vpop.f32.mrb[17].mxu1  ;;  %v1027_v24 = vpop.f32.mrb[17].mxu0 }
 0x210   :  { %v955_v25 = vadd.f32 %v954_v23, %v1768_v19  ;;  %v956_v26 = vpop.f32.mrb[18].mxu1  ;;  %v1029_v27 = vpop.f32.mrb[18].mxu0 }
 0x211   :  { %v1026_v29 = vadd.f32 %v1025_v21, %v953_v22  ;;  %v957_v30 = vadd.f32 %v956_v26, %v1765_v18  ;;  %v958_v31 = vpop.f32.mrb[19].mxu1  ;;  %v1031_v32 = vpop.f32.mrb[19].mxu0 }
 0x212   :  { %v1028_v33 = vadd.f32 %v1027_v24, %v955_v25  ;;  %v959_v34 = vadd.f32 %v958_v31, %v1768_v19 }
 0x213   :  { %v1064_v35 = vmul.f32 0.2, %v1026_v29  ;;  %v1030_v36 = vadd.f32 %v1029_v27, %v957_v30 }
 0x214   :  { %v1065_v38 = vmul.f32 0.2, %v1028_v33  ;;  %v1032_v39 = vadd.f32 %v1031_v32, %v959_v34 }
 0x215   :  { %v1080_v41 = vmax.f32 %v1026_v29, %v1064_v35  ;;  %v1066_v42 = vmul.f32 0.2, %v1030_v36 }
 0x216   :  { %v1081_v43 = vmax.f32 %v1028_v33, %v1065_v38  ;;  %v1067_v44 = vmul.f32 0.2, %v1032_v39  ;;  %v962_v45 = vpop.f32.mrb[20].mxu1  ;;  %v1035_v46 = vpop.f32.mrb[20].mxu0 }
 0x217   :  { %v1082_v47 = vmax.f32 %v1030_v36, %v1066_v42  ;;  %v963_v49 = vadd.f32 %v962_v45, %v1765_v18  ;;  %v964_v50 = vpop.f32.mrb[21].mxu1  ;;  %v1037_v52 = vpop.f32.mrb[21].mxu0  ;;  %v1108_v57 = vmul.f32 %v1778_v37, %v1080_v41 }
 0x218   :  { %v1083_v48 = vmax.f32 %v1032_v39, %v1067_v44  ;;  %v965_v58 = vadd.f32 %v964_v50, %v1768_v19  ;;  %v966_v59 = vpop.f32.mrb[22].mxu1  ;;  %v1039_v60 = vpop.f32.mrb[22].mxu0  ;;  %v1109_v51 = vmul.f32 %v1781_v40, %v1081_v43 }
 0x219   :  { %v1036_v61 = vadd.f32 %v1035_v46, %v963_v49  ;;  %v967_v62 = vadd.f32 %v966_v59, %v1765_v18  ;;  %v968_v63 = vpop.f32.mrb[23].mxu1  ;;  %v1041_v0 = vpop.f32.mrb[23].mxu0  ;;  %v1110_v2 = vmul.f32 %v1778_v37, %v1082_v47 }
 0x21a   :  { %v1038_v3 = vadd.f32 %v1037_v52, %v965_v58  ;;  %v969_v4 = vadd.f32 %v968_v63, %v1768_v19  ;;  %v1124_v5 = vadd.f32 %v1109_v51, %v1108_v57  ;;  %v1111_v6 = vmul.f32 %v1781_v40, %v1083_v48 }
 0x21b   :  { %v1068_v7 = vmul.f32 0.2, %v1036_v61  ;;  %v1040_v8 = vadd.f32 %v1039_v60, %v967_v62 }
 0x21c   :  { %v1069_v9 = vmul.f32 0.2, %v1038_v3  ;;  %v1042_v10 = vadd.f32 %v1041_v0, %v969_v4  ;;  %1125 = vadd.xlane.f32.xlu0 %v1124_v5  ;;  %v1127_v53 = vadd.f32 %v1111_v6, %v1110_v2 }
 0x21d   :  { %v1084_v11 = vmax.f32 %v1036_v61, %v1068_v7  ;;  %v1070_v54 = vmul.f32 0.2, %v1040_v8 }
 0x21e   :  { %v1085_v12 = vmax.f32 %v1038_v3, %v1069_v9  ;;  %v1071_v1 = vmul.f32 0.2, %v1042_v10  ;;  %v972_v13 = vpop.f32.mrb[24].mxu1  ;;  %v1045_v14 = vpop.f32.mrb[24].mxu0 }
 0x21f   :  { %v1086_v15 = vmax.f32 %v1040_v8, %v1070_v54  ;;  %v973_v55 = vadd.f32 %v972_v13, %v1765_v18  ;;  %v974_v16 = vpop.f32.mrb[25].mxu1  ;;  %v1047_v56 = vpop.f32.mrb[25].mxu0  ;;  %v1112_v17 = vmul.f32 %v1778_v37, %v1084_v11 }
 0x220   :  { %v1087_v20 = vmax.f32 %v1042_v10, %v1071_v1  ;;  %v975_v21 = vadd.f32 %v974_v16, %v1768_v19  ;;  %v976_v22 = vpop.f32.mrb[26].mxu1  ;;  %v1049_v23 = vpop.f32.mrb[26].mxu0  ;;  %1128 = vadd.xlane.f32.xlu0 %v1127_v53  ;;  %v1113_v24 = vmul.f32 %v1781_v40, %v1085_v12 }
 0x221   :  { %v1046_v25 = vadd.f32 %v1045_v14, %v973_v55  ;;  %v977_v26 = vadd.f32 %v976_v22, %v1765_v18  ;;  %v978_v27 = vpop.f32.mrb[27].mxu1  ;;  %v1051_v28 = vpop.f32.mrb[27].mxu0  ;;  %v1114_v29 = vmul.f32 %v1778_v37, %v1086_v15 }
 0x222   :  { %v1048_v30 = vadd.f32 %v1047_v56, %v975_v21  ;;  %v979_v31 = vadd.f32 %v978_v27, %v1768_v19  ;;  %v1130_v32 = vadd.f32 %v1113_v24, %v1112_v17  ;;  %v1115_v33 = vmul.f32 %v1781_v40, %v1087_v20  ;;  %v1322_v17 = vld [vmem:[#allocation2] ss:$0 sm:$0xff] }
 0x223   :  { %v1072_v34 = vmul.f32 0.2, %v1046_v25  ;;  %v1050_v35 = vadd.f32 %v1049_v23, %v977_v26 }
 0x224   :  { %v1073_v36 = vmul.f32 0.2, %v1048_v30  ;;  %v1052_v38 = vadd.f32 %v1051_v28, %v979_v31  ;;  %1131 = vadd.xlane.f32.xlu1 %v1130_v32  ;;  %v1133_v39 = vadd.f32 %v1115_v33, %v1114_v29 }
 0x225   :  { %v1088_v41 = vmax.f32 %v1046_v25, %v1072_v34  ;;  %v1074_v42 = vmul.f32 0.2, %v1050_v35 }
 0x226   :  { %v1089_v43 = vmax.f32 %v1048_v30, %v1073_v36  ;;  %v1075_v44 = vmul.f32 0.2, %v1052_v38  ;;  %v982_v45 = vpop.f32.mrb[28].mxu1  ;;  %v1055_v46 = vpop.f32.mrb[28].mxu0 }
 0x227   :  { %v1090_v47 = vmax.f32 %v1050_v35, %v1074_v42  ;;  %v983_v49 = vadd.f32 %v982_v45, %v1765_v18  ;;  %v984_v50 = vpop.f32.mrb[29].mxu1  ;;  %v1057_v52 = vpop.f32.mrb[29].mxu0  ;;  %v1116_v57 = vmul.f32 %v1778_v37, %v1088_v41 }
 0x228   :  { %v1091_v48 = vmax.f32 %v1052_v38, %v1075_v44  ;;  %v985_v58 = vadd.f32 %v984_v50, %v1768_v19  ;;  %v986_v59 = vpop.f32.mrb[30].mxu1  ;;  %v1059_v60 = vpop.f32.mrb[30].mxu0  ;;  %1134 = vadd.xlane.f32.xlu1 %v1133_v39  ;;  %v1117_v51 = vmul.f32 %v1781_v40, %v1089_v43 }
 0x229   :  { %v1056_v61 = vadd.f32 %v1055_v46, %v983_v49  ;;  %v987_v62 = vadd.f32 %v986_v59, %v1765_v18  ;;  %v988_v63 = vpop.f32.mrb[31].mxu1  ;;  %v1061_v0 = vpop.f32.mrb[31].mxu0  ;;  %v1118_v2 = vmul.f32 %v1778_v37, %v1090_v47 }
 0x22a   :  { %v1058_v3 = vadd.f32 %v1057_v52, %v985_v58  ;;  %v989_v4 = vadd.f32 %v988_v63, %v1768_v19  ;;  %v1136_v5 = vadd.f32 %v1117_v51, %v1116_v57  ;;  %v1119_v6 = vmul.f32 %v1781_v40, %v1091_v48 }
 0x22b   :  { %v1076_v7 = vmul.f32 0.2, %v1056_v61  ;;  %v1060_v8 = vadd.f32 %v1059_v60, %v987_v62 }
 0x22c   :  { %v1077_v9 = vmul.f32 0.2, %v1058_v3  ;;  %v1062_v10 = vadd.f32 %v1061_v0, %v989_v4  ;;  %1137 = vadd.xlane.f32.xlu0 %v1136_v5  ;;  %v1139_v53 = vadd.f32 %v1119_v6, %v1118_v2 }
 0x22d   :  { %v1092_v11 = vmax.f32 %v1056_v61, %v1076_v7  ;;  %v1078_v54 = vmul.f32 0.2, %v1060_v8 }
 0x22e   :  { %v1093_v12 = vmax.f32 %v1058_v3, %v1077_v9  ;;  %v1079_v18 = vmul.f32 0.2, %v1062_v10  ;;  %1140 = vadd.xlane.f32.xlu1 %v1139_v53 }
 0x22f   :  { %v1094_v1 = vmax.f32 %v1060_v8, %v1078_v54  ;;  %v1120_v13 = vmul.f32 %v1778_v37, %v1092_v11 }
 0x230   :  { %v1095_v14 = vmax.f32 %v1062_v10, %v1079_v18  ;;  %v1121_v19 = vmul.f32 %v1781_v40, %v1093_v12 }
 0x231   :  { %v1122_v15 = vmul.f32 %v1778_v37, %v1094_v1 }
 0x232   :  { %v1142_v55 = vadd.f32 %v1121_v19, %v1120_v13  ;;  %v1123_v16 = vmul.f32 %v1781_v40, %v1095_v14 }
 0x234   :  { %1143 = vadd.xlane.f32.xlu0 %v1142_v55  ;;  %v1145_v56 = vadd.f32 %v1123_v16, %v1122_v15 }
 0x236   :  { %1146 = vadd.xlane.f32.xlu1 %v1145_v56 }
 0x2a9   :  { %v1126_v20 = vpop.xlane.xlu0 %1125 }
 0x2aa   :  { %v1155_v21 = vadd.f32 %v1322_v17, %v1126_v20 }
 0x2ac   :  { %v1323_v22 = vmul.f32 -1.442695, %v1155_v21 }
 0x2ad   :  { %v1129_v23 = vpop.xlane.xlu0 %1128 }
 0x2ae   :  { %1515 = vpow2.f32 %v1323_v22  ;;  %v1156_v24 = vadd.f32 %v1322_v17, %v1129_v23 }
 0x2b0   :  { %v1324_v25 = vmul.f32 -1.442695, %v1156_v24 }
 0x2b1   :  { %v1132_v26 = vpop.xlane.xlu1 %1131 }
 0x2b2   :  { %1517 = vpow2.f32 %v1324_v25  ;;  %v1157_v27 = vadd.f32 %v1322_v17, %v1132_v26 }
 0x2b4   :  { %v1325_v28 = vmul.f32 -1.442695, %v1157_v27 }
 0x2b5   :  { %v1135_v29 = vpop.xlane.xlu1 %1134 }
 0x2b6   :  { %1519 = vpow2.f32 %v1325_v28  ;;  %v1158_v37 = vadd.f32 %v1322_v17, %v1135_v29 }
 0x2b8   :  { %v1516_v30 = vpop.eup %1515  ;;  %v1326_v40 = vmul.f32 -1.442695, %v1158_v37 }
 0x2b9   :  { %v1187_v31 = vadd.f32 1.0, %v1516_v30  ;;  %v1138_v32 = vpop.xlane.xlu0 %1137 }
 0x2ba   :  { %1521 = vpow2.f32 %v1326_v40  ;;  %v1159_v33 = vadd.f32 %v1322_v17, %v1138_v32 }
 0x2bb   :  { %1523 = vrcp.f32 %v1187_v31  ;;  %v1141_v34 = vpop.xlane.xlu1 %1140 }
 0x2bc   :  { %v1518_v35 = vpop.eup %1517  ;;  %v1327_v36 = vmul.f32 -1.442695, %v1159_v33  ;;  %v1160_v38 = vadd.f32 %v1322_v17, %v1141_v34 }
 0x2bd   :  { %v1188_v39 = vadd.f32 1.0, %v1518_v35 }
 0x2be   :  { %1525 = vpow2.f32 %v1327_v36  ;;  %v1328_v41 = vmul.f32 -1.442695, %v1160_v38 }
 0x2bf   :  { %1527 = vrcp.f32 %v1188_v39 }
 0x2c0   :  { %v1520_v42 = vpop.eup %1519  ;;  %1529 = vpow2.f32 %v1328_v41 }
 0x2c1   :  { %v1189_v43 = vadd.f32 1.0, %v1520_v42  ;;  %v1144_v44 = vpop.xlane.xlu0 %1143 }
 0x2c2   :  { %v1161_v45 = vadd.f32 %v1322_v17, %v1144_v44 }
 0x2c3   :  { %1531 = vrcp.f32 %v1189_v43  ;;  %v1147_v46 = vpop.xlane.xlu1 %1146 }
 0x2c4   :  { %v1522_v47 = vpop.eup %1521  ;;  %v1329_v49 = vmul.f32 -1.442695, %v1161_v45  ;;  %v1162_v50 = vadd.f32 %v1322_v17, %v1147_v46 }
 0x2c5   :  { %v1524_v52 = vpop.eup %1523  ;;  %v1190_v57 = vadd.f32 1.0, %v1522_v47 }
 0x2c6   :  { %1212 = vst.msk [vmem:[%s1850_s7] sm:$0xff] %vm1211_vm0, %v1524_v52  ;;  %1533 = vpow2.f32 %v1329_v49  ;;  %v1330_v48 = vmul.f32 -1.442695, %v1162_v50 }
 0x2c7   :  { %1535 = vrcp.f32 %v1190_v57 }
 0x2c8   :  { %v1526_v58 = vpop.eup %1525  ;;  %1537 = vpow2.f32 %v1330_v48 }
 0x2c9   :  { %v1528_v59 = vpop.eup %1527  ;;  %v1191_v60 = vadd.f32 1.0, %v1526_v58 }
 0x2ca   :  { %v1530_v51 = vpop.eup %1529  ;;  %1213 = vst.msk [vmem:[%s1850_s7 + $0x8] sm:$0xff] %vm1211_vm0, %v1528_v59 }
 0x2cb   :  { %1539 = vrcp.f32 %v1191_v60  ;;  %v1192_v61 = vadd.f32 1.0, %v1530_v51 }
 0x2cd   :  { %v1532_v62 = vpop.eup %1531  ;;  %1541 = vrcp.f32 %v1192_v61 }
 0x2ce   :  { %1214 = vst.msk [vmem:[%s1850_s7 + $0x10] sm:$0xff] %vm1211_vm0, %v1532_v62 }
 0x2d0   :  { %v1534_v63 = vpop.eup %1533 }
 0x2d1   :  { %v1536_v0 = vpop.eup %1535  ;;  %v1193_v2 = vadd.f32 1.0, %v1534_v63 }
 0x2d2   :  { %v1538_v3 = vpop.eup %1537  ;;  %1215 = vst.msk [vmem:[%s1850_s7 + $0x18] sm:$0xff] %vm1211_vm0, %v1536_v0 }
 0x2d3   :  { %1543 = vrcp.f32 %v1193_v2  ;;  %v1194_v4 = vadd.f32 1.0, %v1538_v3 }
 0x2d5   :  { %v1540_v5 = vpop.eup %1539  ;;  %1545 = vrcp.f32 %v1194_v4 }
 0x2d6   :  { %1216 = vst.msk [vmem:[%s1850_s7 + $0x20] sm:$0xff] %vm1211_vm0, %v1540_v5 }
 0x2d7   :  { %v1542_v6 = vpop.eup %1541 }
 0x2d8   :  { %1217 = vst.msk [vmem:[%s1850_s7 + $0x28] sm:$0xff] %vm1211_vm0, %v1542_v6 }
 0x2dd   :  { %v1544_v7 = vpop.eup %1543 }
 0x2de   :  { %1218 = vst.msk [vmem:[%s1850_s7 + $0x30] sm:$0xff] %vm1211_vm0, %v1544_v7 }
 0x2df   :  { %v1546_v8 = vpop.eup %1545 }
 0x2e0   :  { %1219 = vst.msk [vmem:[%s1850_s7 + $0x38] sm:$0xff] %vm1211_vm0, %v1546_v8 }
 0x2e1   :  { %1224 = vsyncpa [#allocation4], 1 }
 0x2e2   :  { %1225 = vsyncpa [#allocation6], 1 }

// kernel: tpu_custom_call.1
= control target key start
LH: loop header
LB: loop body
LE: loop exit
PB: predicated region body
PF: predicated region fallthrough
CT: control target
= control target key end

     0   :  { %s1843_s0 = inlined_call_operand.hbm [shape: f32[64,128], index: 0, kind: input, shape index: {}]   ;;  %s1844_s1 = inlined_call_operand.hbm [shape: bf16[128,512], index: 1, kind: input, shape index: {}]   ;;  %s1845_s2 = inlined_call_operand.vmem [shape: f32[1,512], index: 2, kind: input, shape index: {}]   ;;  %s1846_s3 = inlined_call_operand.hbm [shape: bf16[512,256], index: 3, kind: input, shape index: {}]   ;;  %s1847_s4 = inlined_call_operand.vmem [shape: f32[1,256], index: 4, kind: input, shape index: {}]   ;;  %s1848_s5 = inlined_call_operand.vmem [shape: f32[1,256], index: 5, kind: input, shape index: {}]   ;;  %s1849_s6 = inlined_call_operand.<no memory space> [shape: f32[1,1], index: 6, kind: input, shape index: {}]   ;;  %s1850_s7 = inlined_call_operand.vmem [shape: f32[64,1], index: 7, kind: output, shape index: {}]  }
   0x1   :  { %v12_v0 = vstv %s1849_s6 }
   0x2   :  { %13 = vst [vmem:[#allocation2] sm:$0x1] %v12_v0 }
   0x3   :  { %14 = vsyncpa [#allocation4], 0 }
   0x4   :  { %15 = vsyncpa [#allocation6], 0  ;;  %s1617_s26 = smov [#allocation5]   ;;  %s1547_s30 = scalar_lea.hbm %s1844_s1, 4096 }
   0x5   :  { %s33_s27 = sshll.u32 %s1617_s26, 4  ;;  %p1548_p0 = scmp.ne.s32.totalorder %s1844_s1, %s1547_s30  ;;  %s34_s27 = int_to_ptr.vmem [resolvable:$true] %s33_s27 }
   0x6   :  { %p1551_p1 = scmp.lt.u32.totalorder %s1547_s30, %s1844_s1 }
   0x8   :  { %p1553_p2 = pnand %p1551_p1, %p1548_p0 }
   0xa   :  { %1556 = shalt.err (!%p1553_p2)
}
   0xb   :  { %s1557_s6 = scalar_lea.vmem %s34_s27, 4096  ;;  %p1562_p4 = scmp.lt.s32.totalorder %s34_s27, %s34_s27 }
   0xc   :  { %p1558_p3 = scmp.ne.s32.totalorder %s34_s27, %s1557_s6  ;;  %p1563_p5 = scmp.lt.s32.totalorder %s1557_s6, %s1557_s6 }
   0xe   :  { %p1564_p6 = por %p1563_p5, %p1562_p4 }
  0x10   :  { %p1565_p7 = pnand %p1564_p6, %p1558_p3 }
  0x12   :  { %1568 = shalt.err (!%p1565_p7)
}
  0x13   :  { %s1618_s12 = smov 256   ;;  %s1619_s13 = smov 16  }
  0x14   :  { %39 = dma.hbm_to_vmem [thread:$0]  %s1844_s1, 4096, %s34_s27, [#allocation6], %s1618_s12, %s1618_s12, %s1619_s13  }
  0x15   :  { %s1620_s16 = smov [#allocation3]   ;;  %s1569_s20 = scalar_lea.hbm %s1843_s0, 1024 }
  0x16   :  { %s21_s17 = sshll.u32 %s1620_s16, 4  ;;  %p1570_p8 = scmp.ne.s32.totalorder %s1843_s0, %s1569_s20  ;;  %s22_s17 = int_to_ptr.vmem [resolvable:$true] %s21_s17 }
  0x17   :  { %p1573_p9 = scmp.lt.u32.totalorder %s1569_s20, %s1843_s0 }
  0x19   :  { %p1575_p10 = pnand %p1573_p9, %p1570_p8 }
  0x1b   :  { %1578 = shalt.err (!%p1575_p10)
}
  0x1c   :  { %s1579_s25 = scalar_lea.vmem %s22_s17, 1024  ;;  %p1584_p12 = scmp.lt.s32.totalorder %s22_s17, %s22_s17 }
  0x1d   :  { %p1580_p11 = scmp.ne.s32.totalorder %s22_s17, %s1579_s25  ;;  %p1585_p13 = scmp.lt.s32.totalorder %s1579_s25, %s1579_s25 }
  0x1f   :  { %p1586_p0 = por %p1585_p13, %p1584_p12 }
  0x21   :  { %p1587_p1 = pnand %p1586_p0, %p1580_p11 }
  0x23   :  { %1590 = shalt.err (!%p1587_p1)
}
  0x24   :  { %s1621_s1 = smov 128   ;;  %s1622_s26 = smov 8  }
  0x25   :  { %27 = dma.hbm_to_vmem [thread:$0]  %s1843_s0, 1024, %s22_s17, [#allocation4], %s1621_s1, %s1621_s1, %s1622_s26  }
  0x26   :  { %s1623_s29 = smov [#allocation7]   ;;  %s1591_s10 = scalar_lea.hbm %s1846_s3, 8192 }
  0x27   :  { %s47_s30 = sshll.u32 %s1623_s29, 4  ;;  %p1592_p2 = scmp.ne.s32.totalorder %s1846_s3, %s1591_s10  ;;  %s48_s30 = int_to_ptr.vmem [resolvable:$true] %s47_s30 }
  0x28   :  { %p1595_p3 = scmp.lt.u32.totalorder %s1591_s10, %s1846_s3 }
  0x2a   :  { %p1597_p4 = pnand %p1595_p3, %p1592_p2 }
  0x2c   :  { %1600 = shalt.err (!%p1597_p4)
}
  0x2d   :  { %s1601_s14 = scalar_lea.vmem %s48_s30, 8192  ;;  %p1606_p6 = scmp.lt.s32.totalorder %s48_s30, %s48_s30 }
  0x2e   :  { %p1602_p5 = scmp.ne.s32.totalorder %s48_s30, %s1601_s14  ;;  %p1607_p7 = scmp.lt.s32.totalorder %s1601_s14, %s1601_s14 }
  0x30   :  { %p1608_p8 = por %p1607_p7, %p1606_p6 }
  0x32   :  { %p1609_p9 = pnand %p1608_p8, %p1602_p5 }
  0x34   :  { %1612 = shalt.err (!%p1609_p9)
}
  0x35   :  { %53 = dma.hbm_to_vmem [thread:$0]  %s1846_s3, 8192, %s48_s30, [#allocation6], %s1621_s1, %s1621_s1, %s1622_s26  }
  0x36   :  { %1613 = dma.done.wait [#allocation4], 1024  }
  0x37   :  { %1614 = vsyncadd [#allocation4], 4294966272 }
  0x38   :  { %1615 = dma.done.wait [#allocation6], 12288  }
  0x39   :  { %1616 = vsyncadd [#allocation6], 4294955008  ;;  %v1624_v1 = vmov 0   ;;  %v1371_v2 = vld [vmem:[#allocation5 + $0x4] ss:$16 sps:$4 sm:$0xff]   ;;  %v71_v35 = vld [vmem:[#allocation3 + $0x8] sm:$0xff] }
  0x3a   :  { %392 = vmatprep.mubr.bf16.mxu0 %v1624_v1  ;;  %465 = vmatprep.mubr.bf16.mxu1 %v1624_v1  ;;  %v1373_v3 = vld [vmem:[#allocation5 + $0xc] ss:$16 sps:$4 sm:$0xff]   ;;  %v1375_v4 = vld [vmem:[#allocation5] ss:$16 sps:$4 sm:$0xff]   ;;  %v1376_v5 = vld [vmem:[#allocation5 + $0x8] ss:$16 sps:$4 sm:$0xff]  }
  0x3b   :  { %360 = vmatprep.subr.bf16.mxu0 %v1371_v2  ;;  %433 = vmatprep.subr.bf16.mxu1 %v1373_v3  ;;  %v1377_v6 = vld [vmem:[#allocation5 + $0x24] ss:$16 sps:$4 sm:$0xff]   ;;  %v1379_v7 = vld [vmem:[#allocation5 + $0x2c] ss:$16 sps:$4 sm:$0xff]   ;;  %v1381_v8 = vld [vmem:[#allocation5 + $0x20] ss:$16 sps:$4 sm:$0xff]  }
  0x3c   :  { %361 = vmatpush1.bf16.msra.mxu0 %v1375_v4  ;;  %434 = vmatpush1.bf16.msra.mxu1 %v1376_v5  ;;  %v1382_v9 = vld [vmem:[#allocation5 + $0x28] ss:$16 sps:$4 sm:$0xff]   ;;  %v1383_v10 = vld [vmem:[#allocation5 + $0x44] ss:$16 sps:$4 sm:$0xff]   ;;  %v1385_v11 = vld [vmem:[#allocation5 + $0x4c] ss:$16 sps:$4 sm:$0xff]  }
  0x3d   :  { %362 = vmatprep.subr.bf16.mxu0 %v1377_v6  ;;  %435 = vmatprep.subr.bf16.mxu1 %v1379_v7  ;;  %v1387_v12 = vld [vmem:[#allocation5 + $0x40] ss:$16 sps:$4 sm:$0xff]   ;;  %v1388_v13 = vld [vmem:[#allocation5 + $0x48] ss:$16 sps:$4 sm:$0xff]   ;;  %v1389_v14 = vld [vmem:[#allocation5 + $0x64] ss:$16 sps:$4 sm:$0xff]  }
  0x3e   :  { %v1391_v15 = vld [vmem:[#allocation5 + $0x6c] ss:$16 sps:$4 sm:$0xff]   ;;  %v1393_v16 = vld [vmem:[#allocation5 + $0x60] ss:$16 sps:$4 sm:$0xff]   ;;  %v1394_v17 = vld [vmem:[#allocation5 + $0x68] ss:$16 sps:$4 sm:$0xff]  }
  0x3f   :  { %v1395_v18 = vld [vmem:[#allocation5 + $0x84] ss:$16 sps:$4 sm:$0xff]   ;;  %v1397_v19 = vld [vmem:[#allocation5 + $0x8c] ss:$16 sps:$4 sm:$0xff]   ;;  %v1399_v20 = vld [vmem:[#allocation5 + $0x80] ss:$16 sps:$4 sm:$0xff]  }
  0x40   :  { %363 = vmatpush1.bf16.msra.mxu0 %v1381_v8  ;;  %436 = vmatpush1.bf16.msra.mxu1 %v1382_v9  ;;  %v1400_v21 = vld [vmem:[#allocation5 + $0x88] ss:$16 sps:$4 sm:$0xff]   ;;  %v1401_v22 = vld [vmem:[#allocation5 + $0xa4] ss:$16 sps:$4 sm:$0xff]   ;;  %v1403_v23 = vld [vmem:[#allocation5 + $0xac] ss:$16 sps:$4 sm:$0xff]  }
  0x41   :  { %364 = vmatprep.subr.bf16.mxu0 %v1383_v10  ;;  %437 = vmatprep.subr.bf16.mxu1 %v1385_v11  ;;  %v1405_v24 = vld [vmem:[#allocation5 + $0xa0] ss:$16 sps:$4 sm:$0xff]   ;;  %v1406_v25 = vld [vmem:[#allocation5 + $0xa8] ss:$16 sps:$4 sm:$0xff]   ;;  %v1407_v26 = vld [vmem:[#allocation5 + $0xc4] ss:$16 sps:$4 sm:$0xff]  }
  0x42   :  { %v1409_v27 = vld [vmem:[#allocation5 + $0xcc] ss:$16 sps:$4 sm:$0xff]   ;;  %v1411_v28 = vld [vmem:[#allocation5 + $0xc0] ss:$16 sps:$4 sm:$0xff]   ;;  %v1412_v29 = vld [vmem:[#allocation5 + $0xc8] ss:$16 sps:$4 sm:$0xff]  }
  0x43   :  { %v1413_v30 = vld [vmem:[#allocation5 + $0xe4] ss:$16 sps:$4 sm:$0xff]   ;;  %v1415_v31 = vld [vmem:[#allocation5 + $0xec] ss:$16 sps:$4 sm:$0xff]   ;;  %v1417_v32 = vld [vmem:[#allocation5 + $0xe0] ss:$16 sps:$4 sm:$0xff]  }
  0x44   :  { %365 = vmatpush1.bf16.msra.mxu0 %v1387_v12  ;;  %438 = vmatpush1.bf16.msra.mxu1 %v1388_v13  ;;  %v1418_v33 = vld [vmem:[#allocation5 + $0xe8] ss:$16 sps:$4 sm:$0xff]   ;;  %v70_v34 = vld [vmem:[#allocation3] sm:$0xff]  ;;  %v1427_v41 = vld [vmem:[#allocation7 + $0x14] ss:$8 sps:$4 sm:$0xff]   ;;  %vm1211_vm0 = vcmask 7168  }
  0x45   :  { %366 = vmatprep.subr.bf16.mxu0 %v1389_v14  ;;  %439 = vmatprep.subr.bf16.mxu1 %v1391_v15  ;;  %v1421_v36 = vld [vmem:[#allocation7 + $0x4] ss:$8 sps:$4 sm:$0xff]   ;;  %v174_v38 = vpack.c.bf16 %v71_v35, %v70_v34  ;;  %v1419_v39 = vld [vmem:[#allocation7] ss:$8 sps:$4 sm:$0xff]   ;;  %v1430_v42 = vld [vmem:[#allocation7 + $0x114] ss:$8 sps:$4 sm:$0xff]  }
  0x46   :  { %v1424_v37 = vld [vmem:[#allocation7 + $0x104] ss:$8 sps:$4 sm:$0xff]   ;;  %v1422_v40 = vld [vmem:[#allocation7 + $0x100] ss:$8 sps:$4 sm:$0xff]   ;;  %v72_v43 = vld [vmem:[#allocation3 + $0x10] sm:$0xff] }
  0x47   :  { %v73_v44 = vld [vmem:[#allocation3 + $0x18] sm:$0xff]  ;;  %v1433_v47 = vld [vmem:[#allocation7 + $0x24] ss:$8 sps:$4 sm:$0xff]   ;;  %v1431_v50 = vld [vmem:[#allocation7 + $0x20] ss:$8 sps:$4 sm:$0xff]  }
  0x48   :  { %367 = vmatpush1.bf16.msra.mxu0 %v1393_v16  ;;  %440 = vmatpush1.bf16.msra.mxu1 %v1394_v17  ;;  %v1425_v45 = vld [vmem:[#allocation7 + $0x10] ss:$8 sps:$4 sm:$0xff]   ;;  %v1436_v48 = vld [vmem:[#allocation7 + $0x124] ss:$8 sps:$4 sm:$0xff]   ;;  %v175_v49 = vpack.c.bf16 %v73_v44, %v72_v43  ;;  %v1434_v51 = vld [vmem:[#allocation7 + $0x120] ss:$8 sps:$4 sm:$0xff]  }
  0x49   :  { %368 = vmatprep.subr.bf16.mxu0 %v1395_v18  ;;  %441 = vmatprep.subr.bf16.mxu1 %v1397_v19  ;;  %v1428_v46 = vld [vmem:[#allocation7 + $0x110] ss:$8 sps:$4 sm:$0xff]   ;;  %v1439_v52 = vld [vmem:[#allocation7 + $0x34] ss:$8 sps:$4 sm:$0xff]   ;;  %v74_v54 = vld [vmem:[#allocation3 + $0x20] sm:$0xff] }
  0x4a   :  { %v1442_v53 = vld [vmem:[#allocation7 + $0x134] ss:$8 sps:$4 sm:$0xff]   ;;  %v75_v55 = vld [vmem:[#allocation3 + $0x28] sm:$0xff]  ;;  %v1437_v56 = vld [vmem:[#allocation7 + $0x30] ss:$8 sps:$4 sm:$0xff]  }
  0x4b   :  { %v1440_v57 = vld [vmem:[#allocation7 + $0x130] ss:$8 sps:$4 sm:$0xff]   ;;  %v1445_v58 = vld [vmem:[#allocation7 + $0x44] ss:$8 sps:$4 sm:$0xff]   ;;  %v176_v60 = vpack.c.bf16 %v75_v55, %v74_v54  ;;  %v1443_v61 = vld [vmem:[#allocation7 + $0x40] ss:$8 sps:$4 sm:$0xff]  }
  0x4c   :  { %369 = vmatpush1.bf16.msra.mxu0 %v1399_v20  ;;  %442 = vmatpush1.bf16.msra.mxu1 %v1400_v21  ;;  %v1448_v59 = vld [vmem:[#allocation7 + $0x144] ss:$8 sps:$4 sm:$0xff]   ;;  %v1446_v62 = vld [vmem:[#allocation7 + $0x140] ss:$8 sps:$4 sm:$0xff]   ;;  %v1451_v63 = vld [vmem:[#allocation7 + $0x54] ss:$8 sps:$4 sm:$0xff]  }
  0x4d   :  { %370 = vmatprep.subr.bf16.mxu0 %v1401_v22  ;;  %443 = vmatprep.subr.bf16.mxu1 %v1403_v23  ;;  %v1454_v0 = vld [vmem:[#allocation7 + $0x154] ss:$8 sps:$4 sm:$0xff]   ;;  %v1449_v4 = vld [vmem:[#allocation7 + $0x50] ss:$8 sps:$4 sm:$0xff]   ;;  %v1457_v6 = vld [vmem:[#allocation7 + $0x64] ss:$8 sps:$4 sm:$0xff]  }
  0x4e   :  { %v76_v2 = vld [vmem:[#allocation3 + $0x30] sm:$0xff]  ;;  %v77_v3 = vld [vmem:[#allocation3 + $0x38] sm:$0xff]  ;;  %v1460_v7 = vld [vmem:[#allocation7 + $0x164] ss:$8 sps:$4 sm:$0xff]  }
  0x4f   :  { %v1452_v5 = vld [vmem:[#allocation7 + $0x150] ss:$8 sps:$4 sm:$0xff]   ;;  %v177_v8 = vpack.c.bf16 %v77_v3, %v76_v2  ;;  %v1455_v9 = vld [vmem:[#allocation7 + $0x60] ss:$8 sps:$4 sm:$0xff]   ;;  %v1463_v11 = vld [vmem:[#allocation7 + $0x74] ss:$8 sps:$4 sm:$0xff]  }
  0x50   :  { %371 = vmatpush1.bf16.msra.mxu0 %v1405_v24  ;;  %444 = vmatpush1.bf16.msra.mxu1 %v1406_v25  ;;  %v1458_v10 = vld [vmem:[#allocation7 + $0x160] ss:$8 sps:$4 sm:$0xff]   ;;  %v1466_v12 = vld [vmem:[#allocation7 + $0x174] ss:$8 sps:$4 sm:$0xff]   ;;  %v1464_v13 = vld [vmem:[#allocation7 + $0x170] ss:$8 sps:$4 sm:$0xff]  }
  0x51   :  { %372 = vmatprep.subr.bf16.mxu0 %v1407_v26  ;;  %445 = vmatprep.subr.bf16.mxu1 %v1409_v27  ;;  %v1469_v14 = vld [vmem:[#allocation7 + $0x84] ss:$8 sps:$4 sm:$0xff]   ;;  %v1467_v16 = vld [vmem:[#allocation7 + $0x80] ss:$8 sps:$4 sm:$0xff]   ;;  %v1475_v18 = vld [vmem:[#allocation7 + $0x94] ss:$8 sps:$4 sm:$0xff]  }
  0x52   :  { %v1472_v15 = vld [vmem:[#allocation7 + $0x184] ss:$8 sps:$4 sm:$0xff]   ;;  %v1470_v17 = vld [vmem:[#allocation7 + $0x180] ss:$8 sps:$4 sm:$0xff]   ;;  %v1478_v19 = vld [vmem:[#allocation7 + $0x194] ss:$8 sps:$4 sm:$0xff]  }
  0x53   :  { %v1473_v20 = vld [vmem:[#allocation7 + $0x90] ss:$8 sps:$4 sm:$0xff]   ;;  %v1481_v22 = vld [vmem:[#allocation7 + $0xa4] ss:$8 sps:$4 sm:$0xff]   ;;  %v1479_v24 = vld [vmem:[#allocation7 + $0xa0] ss:$8 sps:$4 sm:$0xff]  }
  0x54   :  { %373 = vmatpush1.bf16.msra.mxu0 %v1411_v28  ;;  %446 = vmatpush1.bf16.msra.mxu1 %v1412_v29  ;;  %v1476_v21 = vld [vmem:[#allocation7 + $0x190] ss:$8 sps:$4 sm:$0xff]   ;;  %v1484_v23 = vld [vmem:[#allocation7 + $0x1a4] ss:$8 sps:$4 sm:$0xff]   ;;  %v1482_v25 = vld [vmem:[#allocation7 + $0x1a0] ss:$8 sps:$4 sm:$0xff]  }
  0x55   :  { %374 = vmatprep.subr.bf16.mxu0 %v1413_v30  ;;  %447 = vmatprep.subr.bf16.mxu1 %v1415_v31  ;;  %v1487_v26 = vld [vmem:[#allocation7 + $0xb4] ss:$8 sps:$4 sm:$0xff]   ;;  %v1485_v28 = vld [vmem:[#allocation7 + $0xb0] ss:$8 sps:$4 sm:$0xff]   ;;  %v1493_v30 = vld [vmem:[#allocation7 + $0xc4] ss:$8 sps:$4 sm:$0xff]  }
  0x56   :  { %v1490_v27 = vld [vmem:[#allocation7 + $0x1b4] ss:$8 sps:$4 sm:$0xff]   ;;  %v1488_v29 = vld [vmem:[#allocation7 + $0x1b0] ss:$8 sps:$4 sm:$0xff]   ;;  %v1496_v31 = vld [vmem:[#allocation7 + $0x1c4] ss:$8 sps:$4 sm:$0xff]  }
  0x57   :  { %v1499_v34 = vld [vmem:[#allocation7 + $0xd4] ss:$8 sps:$4 sm:$0xff]   ;;  %v1509_v44 = vld [vmem:[#allocation7 + $0xf0] ss:$8 sps:$4 sm:$0xff]  }
  0x58   :  { %375 = vmatpush1.bf16.msra.mxu0 %v1417_v32  ;;  %448 = vmatpush1.bf16.msra.mxu1 %v1418_v33  ;;  %v1491_v32 = vld [vmem:[#allocation7 + $0xc0] ss:$8 sps:$4 sm:$0xff]   ;;  %v1502_v35 = vld [vmem:[#allocation7 + $0x1d4] ss:$8 sps:$4 sm:$0xff]  }
  0x59   :  { %918 = vmatprep.subr.bf16.mxu1 %v1421_v36  ;;  %991 = vmatprep.subr.bf16.mxu0 %v1424_v37  ;;  %v1494_v33 = vld [vmem:[#allocation7 + $0x1c0] ss:$8 sps:$4 sm:$0xff]   ;;  %v1497_v36 = vld [vmem:[#allocation7 + $0xd0] ss:$8 sps:$4 sm:$0xff]   ;;  %v1514_v43 = vld [vmem:[#allocation7 + $0x1f4] ss:$8 sps:$4 sm:$0xff]  }
  0x5a   :  { %v1500_v37 = vld [vmem:[#allocation7 + $0x1d0] ss:$8 sps:$4 sm:$0xff]  }
  0x5b   :  { %393 = vmatmul.mubr.bf16.vlgmr.msra.gmra.mrb[0].mxu0 %v174_v38  ;;  %466 = vmatmul.mubr.bf16.vlgmr.msra.gmra.mrb[0].mxu1 %v174_v38  ;;  %v1505_v38 = vld [vmem:[#allocation7 + $0xe4] ss:$8 sps:$4 sm:$0xff]  }
  0x5c   :  { %402 = vmatprep.mubr.bf16.mxu0 %v1624_v1  ;;  %475 = vmatprep.mubr.bf16.mxu1 %v1624_v1 }
  0x5d   :  { %919 = vmatpush1.bf16.msra.mxu1 %v1419_v39  ;;  %992 = vmatpush1.bf16.msra.mxu0 %v1422_v40  ;;  %v1508_v39 = vld [vmem:[#allocation7 + $0x1e4] ss:$8 sps:$4 sm:$0xff]   ;;  %v1503_v40 = vld [vmem:[#allocation7 + $0xe0] ss:$8 sps:$4 sm:$0xff]  }
  0x5e   :  { %920 = vmatprep.subr.bf16.mxu1 %v1427_v41  ;;  %993 = vmatprep.subr.bf16.mxu0 %v1430_v42  ;;  %v1506_v41 = vld [vmem:[#allocation7 + $0x1e0] ss:$8 sps:$4 sm:$0xff]   ;;  %v1511_v42 = vld [vmem:[#allocation7 + $0xf4] ss:$8 sps:$4 sm:$0xff]  }
  0x61   :  { %921 = vmatpush1.bf16.msra.mxu1 %v1425_v45  ;;  %994 = vmatpush1.bf16.msra.mxu0 %v1428_v46  ;;  %v1512_v45 = vld [vmem:[#allocation7 + $0x1f0] ss:$8 sps:$4 sm:$0xff]   ;;  %v180_v46 = vlaneseq }
  0x62   :  { %922 = vmatprep.subr.bf16.mxu1 %v1433_v47  ;;  %995 = vmatprep.subr.bf16.mxu0 %v1436_v48 }
  0x63   :  { %403 = vmatmul.mubr.bf16.gmra.mrb[4].mxu0 %v175_v49  ;;  %476 = vmatmul.mubr.bf16.gmra.mrb[4].mxu1 %v175_v49  ;;  %v181_v47 = vshrl.u32 %v180_v46, 7 }
  0x64   :  { %412 = vmatprep.mubr.bf16.mxu0 %v1624_v1  ;;  %485 = vmatprep.mubr.bf16.mxu1 %v1624_v1 }
  0x65   :  { %923 = vmatpush1.bf16.msra.mxu1 %v1431_v50  ;;  %996 = vmatpush1.bf16.msra.mxu0 %v1434_v51  ;;  %v1712_v48 = vsub.s32 0, %v181_v47  ;;  %v190_v49 = vsub.s32 2, %v181_v47  ;;  %v178_v50 = vld [vmem:[%s1845_s2] sm:$0xf]  ;;  %v1717_v51 = vsub.s32 1, %v181_v47 }
  0x66   :  { %924 = vmatprep.subr.bf16.mxu1 %v1439_v52  ;;  %997 = vmatprep.subr.bf16.mxu0 %v1442_v53  ;;  %v194_v52 = vsub.s32 3, %v181_v47 }
  0x67   :  { %v1720_v53 = vrot.slane %v178_v50, %v1712_v48  ;;  %v1722_v54 = vrot.slane %v178_v50, %v190_v49  ;;  %v1725_v55 = vrot.slane %v178_v50, %v1717_v51 }
  0x69   :  { %925 = vmatpush1.bf16.msra.mxu1 %v1437_v56  ;;  %998 = vmatpush1.bf16.msra.mxu0 %v1440_v57  ;;  %v1727_v56 = vrot.slane %v178_v50, %v194_v52 }
  0x6a   :  { %926 = vmatprep.subr.bf16.mxu1 %v1445_v58  ;;  %999 = vmatprep.subr.bf16.mxu0 %v1448_v59 }
  0x6b   :  { %413 = vmatmul.mubr.bf16.gmra.mrb[8].mxu0 %v176_v60  ;;  %486 = vmatmul.mubr.bf16.gmra.mrb[8].mxu1 %v176_v60 }
  0x6c   :  { %422 = vmatprep.mubr.bf16.mxu0 %v1624_v1  ;;  %495 = vmatprep.mubr.bf16.mxu1 %v1624_v1  ;;  %v1461_v1 = vld [vmem:[#allocation7 + $0x70] ss:$8 sps:$4 sm:$0xff]  }
  0x6d   :  { %927 = vmatpush1.bf16.msra.mxu1 %v1443_v61  ;;  %1000 = vmatpush1.bf16.msra.mxu0 %v1446_v62 }
  0x6e   :  { %928 = vmatprep.subr.bf16.mxu1 %v1451_v63  ;;  %1001 = vmatprep.subr.bf16.mxu0 %v1454_v0 }
  0x71   :  { %929 = vmatpush1.bf16.msra.mxu1 %v1449_v4  ;;  %1002 = vmatpush1.bf16.msra.mxu0 %v1452_v5 }
  0x72   :  { %930 = vmatprep.subr.bf16.mxu1 %v1457_v6  ;;  %1003 = vmatprep.subr.bf16.mxu0 %v1460_v7 }
  0x73   :  { %423 = vmatmul.mubr.bf16.gmra.mrb[12].mxu0 %v177_v8  ;;  %496 = vmatmul.mubr.bf16.gmra.mrb[12].mxu1 %v177_v8 }
  0x75   :  { %931 = vmatpush1.bf16.msra.mxu1 %v1455_v9  ;;  %1004 = vmatpush1.bf16.msra.mxu0 %v1458_v10 }
  0x76   :  { %932 = vmatprep.subr.bf16.mxu1 %v1463_v11  ;;  %1005 = vmatprep.subr.bf16.mxu0 %v1466_v12 }
  0x79   :  { %933 = vmatpush1.bf16.msra.mxu1 %v1461_v1  ;;  %1006 = vmatpush1.bf16.msra.mxu0 %v1464_v13 }
  0x7a   :  { %934 = vmatprep.subr.bf16.mxu1 %v1469_v14  ;;  %1007 = vmatprep.subr.bf16.mxu0 %v1472_v15 }
  0x7d   :  { %935 = vmatpush1.bf16.msra.mxu1 %v1467_v16  ;;  %1008 = vmatpush1.bf16.msra.mxu0 %v1470_v17 }
  0x7e   :  { %936 = vmatprep.subr.bf16.mxu1 %v1475_v18  ;;  %1009 = vmatprep.subr.bf16.mxu0 %v1478_v19 }
  0x81   :  { %937 = vmatpush1.bf16.msra.mxu1 %v1473_v20  ;;  %1010 = vmatpush1.bf16.msra.mxu0 %v1476_v21 }
  0x82   :  { %938 = vmatprep.subr.bf16.mxu1 %v1481_v22  ;;  %1011 = vmatprep.subr.bf16.mxu0 %v1484_v23 }
  0x85   :  { %939 = vmatpush1.bf16.msra.mxu1 %v1479_v24  ;;  %1012 = vmatpush1.bf16.msra.mxu0 %v1482_v25 }
  0x86   :  { %940 = vmatprep.subr.bf16.mxu1 %v1487_v26  ;;  %1013 = vmatprep.subr.bf16.mxu0 %v1490_v27 }
  0x89   :  { %941 = vmatpush1.bf16.msra.mxu1 %v1485_v28  ;;  %1014 = vmatpush1.bf16.msra.mxu0 %v1488_v29 }
  0x8a   :  { %942 = vmatprep.subr.bf16.mxu1 %v1493_v30  ;;  %1015 = vmatprep.subr.bf16.mxu0 %v1496_v31 }
  0x8d   :  { %943 = vmatpush1.bf16.msra.mxu1 %v1491_v32  ;;  %1016 = vmatpush1.bf16.msra.mxu0 %v1494_v33 }
  0x8e   :  { %944 = vmatprep.subr.bf16.mxu1 %v1499_v34  ;;  %1017 = vmatprep.subr.bf16.mxu0 %v1502_v35 }
  0x91   :  { %945 = vmatpush1.bf16.msra.mxu1 %v1497_v36  ;;  %1018 = vmatpush1.bf16.msra.mxu0 %v1500_v37 }
  0x92   :  { %946 = vmatprep.subr.bf16.mxu1 %v1505_v38  ;;  %1019 = vmatprep.subr.bf16.mxu0 %v1508_v39 }
  0x95   :  { %947 = vmatpush1.bf16.msra.mxu1 %v1503_v40  ;;  %1020 = vmatpush1.bf16.msra.mxu0 %v1506_v41 }
  0x96   :  { %948 = vmatprep.subr.bf16.mxu1 %v1511_v42  ;;  %1021 = vmatprep.subr.bf16.mxu0 %v1514_v43 }
  0x99   :  { %949 = vmatpush1.bf16.msra.mxu1 %v1509_v44  ;;  %1022 = vmatpush1.bf16.msra.mxu0 %v1512_v45 }
 0x12e   :  { %v394_v57 = vpop.f32.mrb[0].mxu0  ;;  %v467_v58 = vpop.f32.mrb[0].mxu1 }
 0x12f   :  { %v395_v59 = vadd.f32 %v394_v57, %v1720_v53  ;;  %v468_v60 = vadd.f32 %v467_v58, %v1722_v54  ;;  %v396_v61 = vpop.f32.mrb[1].mxu0  ;;  %v469_v62 = vpop.f32.mrb[1].mxu1 }
 0x130   :  { %v397_v63 = vadd.f32 %v396_v61, %v1725_v55  ;;  %v470_v0 = vadd.f32 %v469_v62, %v1727_v56  ;;  %v398_v2 = vpop.f32.mrb[2].mxu0  ;;  %v471_v3 = vpop.f32.mrb[2].mxu1 }
 0x131   :  { %v506_v4 = vmul.f32 0.2, %v395_v59  ;;  %v508_v5 = vmul.f32 0.2, %v468_v60  ;;  %v399_v6 = vadd.f32 %v398_v2, %v1720_v53  ;;  %v472_v7 = vadd.f32 %v471_v3, %v1722_v54  ;;  %v400_v8 = vpop.f32.mrb[3].mxu0  ;;  %v473_v9 = vpop.f32.mrb[3].mxu1 }
 0x132   :  { %v507_v10 = vmul.f32 0.2, %v397_v63  ;;  %v509_v11 = vmul.f32 0.2, %v470_v0  ;;  %v401_v12 = vadd.f32 %v400_v8, %v1725_v55  ;;  %v474_v1 = vadd.f32 %v473_v9, %v1727_v56 }
 0x133   :  { %v510_v13 = vmul.f32 0.2, %v399_v6  ;;  %v512_v14 = vmul.f32 0.2, %v472_v7  ;;  %v538_v17 = vmax.f32 %v395_v59, %v506_v4  ;;  %v540_v18 = vmax.f32 %v468_v60, %v508_v5 }
 0x134   :  { %v511_v15 = vmul.f32 0.2, %v401_v12  ;;  %v513_v16 = vmul.f32 0.2, %v474_v1  ;;  %v539_v21 = vmax.f32 %v397_v63, %v507_v10  ;;  %v541_v22 = vmax.f32 %v470_v0, %v509_v11 }
 0x135   :  { %v542_v19 = vmax.f32 %v399_v6, %v510_v13  ;;  %v544_v20 = vmax.f32 %v472_v7, %v512_v14 }
 0x136   :  { %v543_v23 = vmax.f32 %v401_v12, %v511_v15  ;;  %v545_v24 = vmax.f32 %v474_v1, %v513_v16  ;;  %v404_v25 = vpop.f32.mrb[4].mxu0  ;;  %v477_v26 = vpop.f32.mrb[4].mxu1 }
 0x137   :  { %v570_v27 = vpack.c.bf16 %v542_v19, %v538_v17  ;;  %v572_v28 = vpack.c.bf16 %v544_v20, %v540_v18  ;;  %v405_v29 = vadd.f32 %v404_v25, %v1720_v53  ;;  %v478_v30 = vadd.f32 %v477_v26, %v1722_v54  ;;  %v406_v31 = vpop.f32.mrb[5].mxu0  ;;  %v479_v32 = vpop.f32.mrb[5].mxu1 }
 0x138   :  { %v407_v33 = vadd.f32 %v406_v31, %v1725_v55  ;;  %v480_v34 = vadd.f32 %v479_v32, %v1727_v56  ;;  %v408_v35 = vpop.f32.mrb[6].mxu0  ;;  %v481_v36 = vpop.f32.mrb[6].mxu1  ;;  %v571_v37 = vpack.c.bf16 %v543_v23, %v539_v21  ;;  %v573_v38 = vpack.c.bf16 %v545_v24, %v541_v22 }
 0x139   :  { %v514_v39 = vmul.f32 0.2, %v405_v29  ;;  %v516_v40 = vmul.f32 0.2, %v478_v30  ;;  %v409_v41 = vadd.f32 %v408_v35, %v1720_v53  ;;  %v482_v42 = vadd.f32 %v481_v36, %v1722_v54  ;;  %v410_v43 = vpop.f32.mrb[7].mxu0  ;;  %v483_v44 = vpop.f32.mrb[7].mxu1 }
 0x13a   :  { %v515_v45 = vmul.f32 0.2, %v407_v33  ;;  %v517_v46 = vmul.f32 0.2, %v480_v34  ;;  %v411_v47 = vadd.f32 %v410_v43, %v1725_v55  ;;  %v484_v49 = vadd.f32 %v483_v44, %v1727_v56  ;;  %950 = vmatprep.mubr.bf16.mxu1 %v571_v37  ;;  %1023 = vmatprep.mubr.bf16.mxu0 %v573_v38 }
 0x13b   :  { %v518_v50 = vmul.f32 0.2, %v409_v41  ;;  %v520_v52 = vmul.f32 0.2, %v482_v42  ;;  %951 = vmatmul.mubr.bf16.vlgmr.msra.gmra.mrb[16].mxu1 %v570_v27  ;;  %1024 = vmatmul.mubr.bf16.vlgmr.msra.gmra.mrb[16].mxu0 %v572_v28  ;;  %v546_v59 = vmax.f32 %v405_v29, %v514_v39  ;;  %v548_v60 = vmax.f32 %v478_v30, %v516_v40 }
 0x13c   :  { %v519_v57 = vmul.f32 0.2, %v411_v47  ;;  %v521_v58 = vmul.f32 0.2, %v484_v49  ;;  %v547_v63 = vmax.f32 %v407_v33, %v515_v45  ;;  %v549_v0 = vmax.f32 %v480_v34, %v517_v46 }
 0x13d   :  { %v550_v61 = vmax.f32 %v409_v41, %v518_v50  ;;  %v552_v62 = vmax.f32 %v482_v42, %v520_v52 }
 0x13e   :  { %v551_v2 = vmax.f32 %v411_v47, %v519_v57  ;;  %v553_v3 = vmax.f32 %v484_v49, %v521_v58  ;;  %v414_v4 = vpop.f32.mrb[8].mxu0  ;;  %v487_v5 = vpop.f32.mrb[8].mxu1 }
 0x13f   :  { %v415_v6 = vadd.f32 %v414_v4, %v1720_v53  ;;  %v488_v7 = vadd.f32 %v487_v5, %v1722_v54  ;;  %v416_v8 = vpop.f32.mrb[9].mxu0  ;;  %v489_v9 = vpop.f32.mrb[9].mxu1  ;;  %v574_v10 = vpack.c.bf16 %v550_v61, %v546_v59  ;;  %v576_v11 = vpack.c.bf16 %v552_v62, %v548_v60 }
 0x140   :  { %v417_v12 = vadd.f32 %v416_v8, %v1725_v55  ;;  %v490_v1 = vadd.f32 %v489_v9, %v1727_v56  ;;  %v418_v13 = vpop.f32.mrb[10].mxu0  ;;  %v491_v14 = vpop.f32.mrb[10].mxu1  ;;  %v575_v15 = vpack.c.bf16 %v551_v2, %v547_v63  ;;  %v577_v16 = vpack.c.bf16 %v553_v3, %v549_v0 }
 0x141   :  { %v522_v17 = vmul.f32 0.2, %v415_v6  ;;  %v524_v18 = vmul.f32 0.2, %v488_v7  ;;  %v419_v19 = vadd.f32 %v418_v13, %v1720_v53  ;;  %v492_v20 = vadd.f32 %v491_v14, %v1722_v54  ;;  %v420_v21 = vpop.f32.mrb[11].mxu0  ;;  %v493_v22 = vpop.f32.mrb[11].mxu1 }
 0x142   :  { %v523_v23 = vmul.f32 0.2, %v417_v12  ;;  %v525_v24 = vmul.f32 0.2, %v490_v1  ;;  %v421_v25 = vadd.f32 %v420_v21, %v1725_v55  ;;  %v494_v26 = vadd.f32 %v493_v22, %v1727_v56  ;;  %960 = vmatprep.mubr.bf16.mxu1 %v575_v15  ;;  %1033 = vmatprep.mubr.bf16.mxu0 %v577_v16 }
 0x143   :  { %v526_v27 = vmul.f32 0.2, %v419_v19  ;;  %v528_v28 = vmul.f32 0.2, %v492_v20  ;;  %961 = vmatmul.mubr.bf16.gmra.mrb[20].mxu1 %v574_v10  ;;  %1034 = vmatmul.mubr.bf16.gmra.mrb[20].mxu0 %v576_v11  ;;  %v554_v31 = vmax.f32 %v415_v6, %v522_v17  ;;  %v556_v32 = vmax.f32 %v488_v7, %v524_v18  ;;  %v586_v17 = vld [vmem:[%s1847_s4] sm:$0x3] }
 0x144   :  { %v527_v29 = vmul.f32 0.2, %v421_v25  ;;  %v529_v30 = vmul.f32 0.2, %v494_v26  ;;  %v555_v35 = vmax.f32 %v417_v12, %v523_v23  ;;  %v557_v36 = vmax.f32 %v490_v1, %v525_v24 }
 0x145   :  { %v558_v33 = vmax.f32 %v419_v19, %v526_v27  ;;  %v560_v34 = vmax.f32 %v492_v20, %v528_v28  ;;  %v1765_v18 = vrot.slane %v586_v17, %v1712_v48  ;;  %v1768_v19 = vrot.slane %v586_v17, %v1717_v51  ;;  %v1096_v28 = vld [vmem:[%s1848_s5] sm:$0x3] }
 0x146   :  { %v559_v37 = vmax.f32 %v421_v25, %v527_v29  ;;  %v561_v38 = vmax.f32 %v494_v26, %v529_v30  ;;  %v424_v39 = vpop.f32.mrb[12].mxu0  ;;  %v497_v40 = vpop.f32.mrb[12].mxu1 }
 0x147   :  { %v425_v41 = vadd.f32 %v424_v39, %v1720_v53  ;;  %v498_v42 = vadd.f32 %v497_v40, %v1722_v54  ;;  %v426_v43 = vpop.f32.mrb[13].mxu0  ;;  %v499_v44 = vpop.f32.mrb[13].mxu1  ;;  %v578_v45 = vpack.c.bf16 %v558_v33, %v554_v31  ;;  %v580_v46 = vpack.c.bf16 %v560_v34, %v556_v32 }
 0x148   :  { %v427_v47 = vadd.f32 %v426_v43, %v1725_v55  ;;  %v500_v49 = vadd.f32 %v499_v44, %v1727_v56  ;;  %v428_v50 = vpop.f32.mrb[14].mxu0  ;;  %v501_v52 = vpop.f32.mrb[14].mxu1  ;;  %v579_v57 = vpack.c.bf16 %v559_v37, %v555_v35  ;;  %v581_v58 = vpack.c.bf16 %v561_v38, %v557_v36 }
 0x149   :  { %v530_v59 = vmul.f32 0.2, %v425_v41  ;;  %v532_v60 = vmul.f32 0.2, %v498_v42  ;;  %v429_v61 = vadd.f32 %v428_v50, %v1720_v53  ;;  %v502_v62 = vadd.f32 %v501_v52, %v1722_v54  ;;  %v430_v63 = vpop.f32.mrb[15].mxu0  ;;  %v503_v0 = vpop.f32.mrb[15].mxu1 }
 0x14a   :  { %v531_v2 = vmul.f32 0.2, %v427_v47  ;;  %v533_v3 = vmul.f32 0.2, %v500_v49  ;;  %v431_v4 = vadd.f32 %v430_v63, %v1725_v55  ;;  %v504_v5 = vadd.f32 %v503_v0, %v1727_v56  ;;  %970 = vmatprep.mubr.bf16.mxu1 %v579_v57  ;;  %1043 = vmatprep.mubr.bf16.mxu0 %v581_v58 }
 0x14b   :  { %v534_v6 = vmul.f32 0.2, %v429_v61  ;;  %v536_v7 = vmul.f32 0.2, %v502_v62  ;;  %971 = vmatmul.mubr.bf16.gmra.mrb[24].mxu1 %v578_v45  ;;  %1044 = vmatmul.mubr.bf16.gmra.mrb[24].mxu0 %v580_v46  ;;  %v562_v10 = vmax.f32 %v425_v41, %v530_v59  ;;  %v564_v53 = vmax.f32 %v498_v42, %v532_v60 }
 0x14c   :  { %v535_v8 = vmul.f32 0.2, %v431_v4  ;;  %v537_v9 = vmul.f32 0.2, %v504_v5  ;;  %v563_v12 = vmax.f32 %v427_v47, %v531_v2  ;;  %v565_v1 = vmax.f32 %v500_v49, %v533_v3 }
 0x14d   :  { %v566_v11 = vmax.f32 %v429_v61, %v534_v6  ;;  %v568_v54 = vmax.f32 %v502_v62, %v536_v7  ;;  %v1778_v37 = vrot.slane %v1096_v28, %v1712_v48  ;;  %v1781_v40 = vrot.slane %v1096_v28, %v1717_v51 }
 0x14e   :  { %v567_v13 = vmax.f32 %v431_v4, %v535_v8  ;;  %v569_v14 = vmax.f32 %v504_v5, %v537_v9 }
 0x14f   :  { %v582_v15 = vpack.c.bf16 %v566_v11, %v562_v10  ;;  %v584_v55 = vpack.c.bf16 %v568_v54, %v564_v53 }
 0x150   :  { %v583_v16 = vpack.c.bf16 %v567_v13, %v563_v12  ;;  %v585_v56 = vpack.c.bf16 %v569_v14, %v565_v1 }
 0x152   :  { %980 = vmatprep.mubr.bf16.mxu1 %v583_v16  ;;  %1053 = vmatprep.mubr.bf16.mxu0 %v585_v56 }
 0x153   :  { %981 = vmatmul.mubr.bf16.gmra.mrb[28].mxu1 %v582_v15  ;;  %1054 = vmatmul.mubr.bf16.gmra.mrb[28].mxu0 %v584_v55 }
 0x20e   :  { %v952_v20 = vpop.f32.mrb[16].mxu1  ;;  %v1025_v21 = vpop.f32.mrb[16].mxu0 }
 0x20f   :  { %v953_v22 = vadd.f32 %v952_v20, %v1765_v18  ;;  %v954_v23 = vpop.f32.mrb[17].mxu1  ;;  %v1027_v24 = vpop.f32.mrb[17].mxu0 }
 0x210   :  { %v955_v25 = vadd.f32 %v954_v23, %v1768_v19  ;;  %v956_v26 = vpop.f32.mrb[18].mxu1  ;;  %v1029_v27 = vpop.f32.mrb[18].mxu0 }
 0x211   :  { %v1026_v29 = vadd.f32 %v1025_v21, %v953_v22  ;;  %v957_v30 = vadd.f32 %v956_v26, %v1765_v18  ;;  %v958_v31 = vpop.f32.mrb[19].mxu1  ;;  %v1031_v32 = vpop.f32.mrb[19].mxu0 }
 0x212   :  { %v1028_v33 = vadd.f32 %v1027_v24, %v955_v25  ;;  %v959_v34 = vadd.f32 %v958_v31, %v1768_v19 }
 0x213   :  { %v1064_v35 = vmul.f32 0.2, %v1026_v29  ;;  %v1030_v36 = vadd.f32 %v1029_v27, %v957_v30 }
 0x214   :  { %v1065_v38 = vmul.f32 0.2, %v1028_v33  ;;  %v1032_v39 = vadd.f32 %v1031_v32, %v959_v34 }
 0x215   :  { %v1080_v41 = vmax.f32 %v1026_v29, %v1064_v35  ;;  %v1066_v42 = vmul.f32 0.2, %v1030_v36 }
 0x216   :  { %v1081_v43 = vmax.f32 %v1028_v33, %v1065_v38  ;;  %v1067_v44 = vmul.f32 0.2, %v1032_v39  ;;  %v962_v45 = vpop.f32.mrb[20].mxu1  ;;  %v1035_v46 = vpop.f32.mrb[20].mxu0 }
 0x217   :  { %v1082_v47 = vmax.f32 %v1030_v36, %v1066_v42  ;;  %v963_v49 = vadd.f32 %v962_v45, %v1765_v18  ;;  %v964_v50 = vpop.f32.mrb[21].mxu1  ;;  %v1037_v52 = vpop.f32.mrb[21].mxu0  ;;  %v1108_v57 = vmul.f32 %v1778_v37, %v1080_v41 }
 0x218   :  { %v1083_v48 = vmax.f32 %v1032_v39, %v1067_v44  ;;  %v965_v58 = vadd.f32 %v964_v50, %v1768_v19  ;;  %v966_v59 = vpop.f32.mrb[22].mxu1  ;;  %v1039_v60 = vpop.f32.mrb[22].mxu0  ;;  %v1109_v51 = vmul.f32 %v1781_v40, %v1081_v43 }
 0x219   :  { %v1036_v61 = vadd.f32 %v1035_v46, %v963_v49  ;;  %v967_v62 = vadd.f32 %v966_v59, %v1765_v18  ;;  %v968_v63 = vpop.f32.mrb[23].mxu1  ;;  %v1041_v0 = vpop.f32.mrb[23].mxu0  ;;  %v1110_v2 = vmul.f32 %v1778_v37, %v1082_v47 }
 0x21a   :  { %v1038_v3 = vadd.f32 %v1037_v52, %v965_v58  ;;  %v969_v4 = vadd.f32 %v968_v63, %v1768_v19  ;;  %v1124_v5 = vadd.f32 %v1109_v51, %v1108_v57  ;;  %v1111_v6 = vmul.f32 %v1781_v40, %v1083_v48 }
 0x21b   :  { %v1068_v7 = vmul.f32 0.2, %v1036_v61  ;;  %v1040_v8 = vadd.f32 %v1039_v60, %v967_v62 }
 0x21c   :  { %v1069_v9 = vmul.f32 0.2, %v1038_v3  ;;  %v1042_v10 = vadd.f32 %v1041_v0, %v969_v4  ;;  %1125 = vadd.xlane.f32.xlu0 %v1124_v5  ;;  %v1127_v53 = vadd.f32 %v1111_v6, %v1110_v2 }
 0x21d   :  { %v1084_v11 = vmax.f32 %v1036_v61, %v1068_v7  ;;  %v1070_v54 = vmul.f32 0.2, %v1040_v8 }
 0x21e   :  { %v1085_v12 = vmax.f32 %v1038_v3, %v1069_v9  ;;  %v1071_v1 = vmul.f32 0.2, %v1042_v10  ;;  %v972_v13 = vpop.f32.mrb[24].mxu1  ;;  %v1045_v14 = vpop.f32.mrb[24].mxu0 }
 0x21f   :  { %v1086_v15 = vmax.f32 %v1040_v8, %v1070_v54  ;;  %v973_v55 = vadd.f32 %v972_v13, %v1765_v18  ;;  %v974_v16 = vpop.f32.mrb[25].mxu1  ;;  %v1047_v56 = vpop.f32.mrb[25].mxu0  ;;  %v1112_v17 = vmul.f32 %v1778_v37, %v1084_v11 }
 0x220   :  { %v1087_v20 = vmax.f32 %v1042_v10, %v1071_v1  ;;  %v975_v21 = vadd.f32 %v974_v16, %v1768_v19  ;;  %v976_v22 = vpop.f32.mrb[26].mxu1  ;;  %v1049_v23 = vpop.f32.mrb[26].mxu0  ;;  %1128 = vadd.xlane.f32.xlu0 %v1127_v53  ;;  %v1113_v24 = vmul.f32 %v1781_v40, %v1085_v12 }
 0x221   :  { %v1046_v25 = vadd.f32 %v1045_v14, %v973_v55  ;;  %v977_v26 = vadd.f32 %v976_v22, %v1765_v18  ;;  %v978_v27 = vpop.f32.mrb[27].mxu1  ;;  %v1051_v28 = vpop.f32.mrb[27].mxu0  ;;  %v1114_v29 = vmul.f32 %v1778_v37, %v1086_v15 }
 0x222   :  { %v1048_v30 = vadd.f32 %v1047_v56, %v975_v21  ;;  %v979_v31 = vadd.f32 %v978_v27, %v1768_v19  ;;  %v1130_v32 = vadd.f32 %v1113_v24, %v1112_v17  ;;  %v1115_v33 = vmul.f32 %v1781_v40, %v1087_v20  ;;  %v1322_v17 = vld [vmem:[#allocation2] ss:$0 sm:$0xff] }
 0x223   :  { %v1072_v34 = vmul.f32 0.2, %v1046_v25  ;;  %v1050_v35 = vadd.f32 %v1049_v23, %v977_v26 }
 0x224   :  { %v1073_v36 = vmul.f32 0.2, %v1048_v30  ;;  %v1052_v38 = vadd.f32 %v1051_v28, %v979_v31  ;;  %1131 = vadd.xlane.f32.xlu1 %v1130_v32  ;;  %v1133_v39 = vadd.f32 %v1115_v33, %v1114_v29 }
 0x225   :  { %v1088_v41 = vmax.f32 %v1046_v25, %v1072_v34  ;;  %v1074_v42 = vmul.f32 0.2, %v1050_v35 }
 0x226   :  { %v1089_v43 = vmax.f32 %v1048_v30, %v1073_v36  ;;  %v1075_v44 = vmul.f32 0.2, %v1052_v38  ;;  %v982_v45 = vpop.f32.mrb[28].mxu1  ;;  %v1055_v46 = vpop.f32.mrb[28].mxu0 }
 0x227   :  { %v1090_v47 = vmax.f32 %v1050_v35, %v1074_v42  ;;  %v983_v49 = vadd.f32 %v982_v45, %v1765_v18  ;;  %v984_v50 = vpop.f32.mrb[29].mxu1  ;;  %v1057_v52 = vpop.f32.mrb[29].mxu0  ;;  %v1116_v57 = vmul.f32 %v1778_v37, %v1088_v41 }
 0x228   :  { %v1091_v48 = vmax.f32 %v1052_v38, %v1075_v44  ;;  %v985_v58 = vadd.f32 %v984_v50, %v1768_v19  ;;  %v986_v59 = vpop.f32.mrb[30].mxu1  ;;  %v1059_v60 = vpop.f32.mrb[30].mxu0  ;;  %1134 = vadd.xlane.f32.xlu1 %v1133_v39  ;;  %v1117_v51 = vmul.f32 %v1781_v40, %v1089_v43 }
 0x229   :  { %v1056_v61 = vadd.f32 %v1055_v46, %v983_v49  ;;  %v987_v62 = vadd.f32 %v986_v59, %v1765_v18  ;;  %v988_v63 = vpop.f32.mrb[31].mxu1  ;;  %v1061_v0 = vpop.f32.mrb[31].mxu0  ;;  %v1118_v2 = vmul.f32 %v1778_v37, %v1090_v47 }
 0x22a   :  { %v1058_v3 = vadd.f32 %v1057_v52, %v985_v58  ;;  %v989_v4 = vadd.f32 %v988_v63, %v1768_v19  ;;  %v1136_v5 = vadd.f32 %v1117_v51, %v1116_v57  ;;  %v1119_v6 = vmul.f32 %v1781_v40, %v1091_v48 }
 0x22b   :  { %v1076_v7 = vmul.f32 0.2, %v1056_v61  ;;  %v1060_v8 = vadd.f32 %v1059_v60, %v987_v62 }
 0x22c   :  { %v1077_v9 = vmul.f32 0.2, %v1058_v3  ;;  %v1062_v10 = vadd.f32 %v1061_v0, %v989_v4  ;;  %1137 = vadd.xlane.f32.xlu0 %v1136_v5  ;;  %v1139_v53 = vadd.f32 %v1119_v6, %v1118_v2 }
 0x22d   :  { %v1092_v11 = vmax.f32 %v1056_v61, %v1076_v7  ;;  %v1078_v54 = vmul.f32 0.2, %v1060_v8 }
 0x22e   :  { %v1093_v12 = vmax.f32 %v1058_v3, %v1077_v9  ;;  %v1079_v18 = vmul.f32 0.2, %v1062_v10  ;;  %1140 = vadd.xlane.f32.xlu1 %v1139_v53 }
 0x22f   :  { %v1094_v1 = vmax.f32 %v1060_v8, %v1078_v54  ;;  %v1120_v13 = vmul.f32 %v1778_v37, %v1092_v11 }
 0x230   :  { %v1095_v14 = vmax.f32 %v1062_v10, %v1079_v18  ;;  %v1121_v19 = vmul.f32 %v1781_v40, %v1093_v12 }
 0x231   :  { %v1122_v15 = vmul.f32 %v1778_v37, %v1094_v1 }
 0x232   :  { %v1142_v55 = vadd.f32 %v1121_v19, %v1120_v13  ;;  %v1123_v16 = vmul.f32 %v1781_v40, %v1095_v14 }
 0x234   :  { %1143 = vadd.xlane.f32.xlu0 %v1142_v55  ;;  %v1145_v56 = vadd.f32 %v1123_v16, %v1122_v15 }
 0x236   :  { %1146 = vadd.xlane.f32.xlu1 %v1145_v56 }
 0x2a9   :  { %v1126_v20 = vpop.xlane.xlu0 %1125 }
 0x2aa   :  { %v1155_v21 = vadd.f32 %v1322_v17, %v1126_v20 }
 0x2ac   :  { %v1323_v22 = vmul.f32 -1.442695, %v1155_v21 }
 0x2ad   :  { %v1129_v23 = vpop.xlane.xlu0 %1128 }
 0x2ae   :  { %1515 = vpow2.f32 %v1323_v22  ;;  %v1156_v24 = vadd.f32 %v1322_v17, %v1129_v23 }
 0x2b0   :  { %v1324_v25 = vmul.f32 -1.442695, %v1156_v24 }
 0x2b1   :  { %v1132_v26 = vpop.xlane.xlu1 %1131 }
 0x2b2   :  { %1517 = vpow2.f32 %v1324_v25  ;;  %v1157_v27 = vadd.f32 %v1322_v17, %v1132_v26 }
 0x2b4   :  { %v1325_v28 = vmul.f32 -1.442695, %v1157_v27 }
 0x2b5   :  { %v1135_v29 = vpop.xlane.xlu1 %1134 }
 0x2b6   :  { %1519 = vpow2.f32 %v1325_v28  ;;  %v1158_v37 = vadd.f32 %v1322_v17, %v1135_v29 }
 0x2b8   :  { %v1516_v30 = vpop.eup %1515  ;;  %v1326_v40 = vmul.f32 -1.442695, %v1158_v37 }
 0x2b9   :  { %v1187_v31 = vadd.f32 1.0, %v1516_v30  ;;  %v1138_v32 = vpop.xlane.xlu0 %1137 }
 0x2ba   :  { %1521 = vpow2.f32 %v1326_v40  ;;  %v1159_v33 = vadd.f32 %v1322_v17, %v1138_v32 }
 0x2bb   :  { %1523 = vrcp.f32 %v1187_v31  ;;  %v1141_v34 = vpop.xlane.xlu1 %1140 }
 0x2bc   :  { %v1518_v35 = vpop.eup %1517  ;;  %v1327_v36 = vmul.f32 -1.442695, %v1159_v33  ;;  %v1160_v38 = vadd.f32 %v1322_v17, %v1141_v34 }
 0x2bd   :  { %v1188_v39 = vadd.f32 1.0, %v1518_v35 }
 0x2be   :  { %1525 = vpow2.f32 %v1327_v36  ;;  %v1328_v41 = vmul.f32 -1.442695, %v1160_v38 }
 0x2bf   :  { %1527 = vrcp.f32 %v1188_v39 }
 0x2c0   :  { %v1520_v42 = vpop.eup %1519  ;;  %1529 = vpow2.f32 %v1328_v41 }
 0x2c1   :  { %v1189_v43 = vadd.f32 1.0, %v1520_v42  ;;  %v1144_v44 = vpop.xlane.xlu0 %1143 }
 0x2c2   :  { %v1161_v45 = vadd.f32 %v1322_v17, %v1144_v44 }
 0x2c3   :  { %1531 = vrcp.f32 %v1189_v43  ;;  %v1147_v46 = vpop.xlane.xlu1 %1146 }
 0x2c4   :  { %v1522_v47 = vpop.eup %1521  ;;  %v1329_v49 = vmul.f32 -1.442695, %v1161_v45  ;;  %v1162_v50 = vadd.f32 %v1322_v17, %v1147_v46 }
 0x2c5   :  { %v1524_v52 = vpop.eup %1523  ;;  %v1190_v57 = vadd.f32 1.0, %v1522_v47 }
 0x2c6   :  { %1212 = vst.msk [vmem:[%s1850_s7] sm:$0xff] %vm1211_vm0, %v1524_v52  ;;  %1533 = vpow2.f32 %v1329_v49  ;;  %v1330_v48 = vmul.f32 -1.442695, %v1162_v50 }
 0x2c7   :  { %1535 = vrcp.f32 %v1190_v57 }
 0x2c8   :  { %v1526_v58 = vpop.eup %1525  ;;  %1537 = vpow2.f32 %v1330_v48 }
 0x2c9   :  { %v1528_v59 = vpop.eup %1527  ;;  %v1191_v60 = vadd.f32 1.0, %v1526_v58 }
 0x2ca   :  { %v1530_v51 = vpop.eup %1529  ;;  %1213 = vst.msk [vmem:[%s1850_s7 + $0x8] sm:$0xff] %vm1211_vm0, %v1528_v59 }
 0x2cb   :  { %1539 = vrcp.f32 %v1191_v60  ;;  %v1192_v61 = vadd.f32 1.0, %v1530_v51 }
 0x2cd   :  { %v1532_v62 = vpop.eup %1531  ;;  %1541 = vrcp.f32 %v1192_v61 }
 0x2ce   :  { %1214 = vst.msk [vmem:[%s1850_s7 + $0x10] sm:$0xff] %vm1211_vm0, %v1532_v62 }
 0x2d0   :  { %v1534_v63 = vpop.eup %1533 }
 0x2d1   :  { %v1536_v0 = vpop.eup %1535  ;;  %v1193_v2 = vadd.f32 1.0, %v1534_v63 }
 0x2d2   :  { %v1538_v3 = vpop.eup %1537  ;;  %1215 = vst.msk [vmem:[%s1850_s7 + $0x18] sm:$0xff] %vm1211_vm0, %v1536_v0 }
 0x2d3   :  { %1543 = vrcp.f32 %v1193_v2  ;;  %v1194_v4 = vadd.f32 1.0, %v1538_v3 }
 0x2d5   :  { %v1540_v5 = vpop.eup %1539  ;;  %1545 = vrcp.f32 %v1194_v4 }
 0x2d6   :  { %1216 = vst.msk [vmem:[%s1850_s7 + $0x20] sm:$0xff] %vm1211_vm0, %v1540_v5 }
 0x2d7   :  { %v1542_v6 = vpop.eup %1541 }
 0x2d8   :  { %1217 = vst.msk [vmem:[%s1850_s7 + $0x28] sm:$0xff] %vm1211_vm0, %v1542_v6 }
 0x2dd   :  { %v1544_v7 = vpop.eup %1543 }
 0x2de   :  { %1218 = vst.msk [vmem:[%s1850_s7 + $0x30] sm:$0xff] %vm1211_vm0, %v1544_v7 }
 0x2df   :  { %v1546_v8 = vpop.eup %1545 }
 0x2e0   :  { %1219 = vst.msk [vmem:[%s1850_s7 + $0x38] sm:$0xff] %vm1211_vm0, %v1546_v8 }
 0x2e1   :  { %1224 = vsyncpa [#allocation4], 1 }
 0x2e2   :  { %1225 = vsyncpa [#allocation6], 1 }

</bundles_post_ra>
